<compile_context>
chip_gen: v7x
topology: tpu7x:2x2x1
jax: 0.10.0
libtpu: 0.0.40
codegen_flags: <defaults>
</compile_context>

<pallas_src>
import math

import jax
import jax.numpy as jnp
from jax.experimental import pallas as pl
from jax.experimental.pallas import tpu as pltpu

# ---------------- small synthetic DistilBERT config ----------------
VOCAB = 100       # vocab size
MAX_POS = 16      # max position embeddings
B, S = 2, 8       # batch, sequence length
D = 32            # hidden dim
H = 4             # attention heads
HD = D // H       # head dim
FFN = 64          # feed-forward hidden dim
N_LAYERS = 2      # transformer layers
LN_EPS = 1e-12    # DistilBERT LayerNorm eps
STD = 0.02        # init std (DistilBERT initializer_range)


# ---------------- shared math helpers (usable in-kernel and in references) ----------------
def _erf(x, recip=None):
    # Abramowitz & Stegun 7.1.26, |abs err| <= 1.5e-7; uses only exp/mul/add + one
    # reciprocal, so it lowers on all TPU generations (exact-erf GELU like DistilBERT).
    if recip is None:
        recip = lambda v: 1.0 / v
    a1, a2, a3, a4, a5 = 0.254829592, -0.284496736, 1.421413741, -1.453152027, 1.061405429
    p = 0.3275911
    sgn = jnp.where(x >= 0.0, 1.0, -1.0)
    z = jnp.abs(x)
    t = recip(1.0 + p * z)
    poly = ((((a5 * t + a4) * t + a3) * t + a2) * t + a1) * t
    return sgn * (1.0 - poly * jnp.exp(-z * z))


def _gelu(x, recip=None):
    return 0.5 * x * (1.0 + _erf(x * (1.0 / math.sqrt(2.0)), recip=recip))


def _ln(x, g, b, eps=LN_EPS):
    mu = jnp.mean(x, axis=-1, keepdims=True)
    var = jnp.mean((x - mu) ** 2, axis=-1, keepdims=True)
    return (x - mu) * jax.lax.rsqrt(var + eps) * g + b


# ---------------- fused Pallas kernel: whole encoder + whole batch, one step ----------------
def encoder_kernel(ids_ref, mask_ref, wemb_ref, pemb_ref, embln_ref,
                   wqkv_ref, bqkv_ref, wo_ref, dvec_ref, w1_ref, b1_ref, w2_ref,
                   o_ref):
    f32 = jnp.float32
    bf16 = jnp.bfloat16
    approx_recip = lambda v: pl.reciprocal(v, approx=True)

    # ---- in-kernel embedding lookup: one-hot gather on the (idle) MXU (exact: 0/1 weights)
    ids = ids_ref[...]                                                    # (B*S, 1) int32
    onehot = (jax.lax.broadcasted_iota(jnp.int32, (B * S, VOCAB), 1) == ids).astype(f32)
    tok = jnp.dot(onehot, wemb_ref[...], preferred_element_type=f32)      # (B*S, D)
    x = (tok.reshape(B, S, D) + pemb_ref[0:S, :][None]).reshape(B * S, D)

    eln = embln_ref[...]                                                  # (2, D)
    x = _ln(x, eln[0:1], eln[1:2])                                        # embedding LayerNorm

    # additive key mask: 0 = valid, -1e9 = padded; broadcasts over query rows
    add_mask = (1.0 - mask_ref[...].astype(f32)) * (-1e9)                 # (B, 1, S)

    for l in range(N_LAYERS):        # static unroll; all layer weights already in VMEM
        dv = dvec_ref[l]             # (6, D): [bo, ln1_g, ln1_b, ffn_b2, ln2_g, ln2_b]
        wo_l = wo_ref[l]             # (D, D) bf16

        # ---- self-attention: one packed QKV matmul over the flattened (B*S, D) batch.
        # 1/sqrt(HD) is folded into Q columns AND Q bias (DistilBERT scales q after bias).
        qkv = jnp.dot(x.astype(bf16), wqkv_ref[l],
                      preferred_element_type=f32) + bqkv_ref[l]           # (B*S, 3D)
        qkv3 = qkv.reshape(B, S, 3 * D)                                   # split batch for scores

        attn = jnp.zeros((B * S, D), f32)
        for h in range(H):           # static head loop; no context scratch
            q_h = qkv3[:, :, h * HD:(h + 1) * HD]                         # (B, S, HD)
            k_h = qkv3[:, :, D + h * HD:D + (h + 1) * HD]
            v_h = qkv3[:, :, 2 * D + h * HD:2 * D + (h + 1) * HD]
            s = jnp.einsum("bqh,bkh->bqk", q_h, k_h,
                           preferred_element_type=f32) + add_mask         # (B, S, S)
            s = s - jnp.max(s, axis=-1, keepdims=True)
            e = jnp.exp(s)
            # approx reciprocal -> rows sum to 1 only within ~1e-4 relative; fine at 2e-3 tol
            p = e * pl.reciprocal(jnp.sum(e, axis=-1, keepdims=True), approx=True)
            ctx = jnp.einsum("bqk,bkh->bqh", p, v_h,
                             preferred_element_type=f32)                  # (B, S, HD)
            # fold this head's out-projection rows straight into the attention output
            attn = attn + jnp.dot(ctx.reshape(B * S, HD).astype(bf16),
                                  wo_l[h * HD:(h + 1) * HD, :],
                                  preferred_element_type=f32)             # (B*S, D)

        h1 = _ln(x + attn + dv[0:1], dv[1:2], dv[2:3])                    # sa_layer_norm

        # ---- feed-forward (exact-erf GELU, reciprocal on the EUP) ----
        f = _gelu(jnp.dot(h1.astype(bf16), w1_ref[l],
                          preferred_element_type=f32) + b1_ref[l],
                  recip=approx_recip)                                     # (B*S, FFN)
        f = jnp.dot(f.astype(bf16), w2_ref[l],
                    preferred_element_type=f32) + dv[3:4]                 # (B*S, D)
        x = _ln(h1 + f, dv[4:5], dv[5:6])                                 # output_layer_norm

    # Only the CLS rows leave the kernel (target_token_idx = 0).  Padded positions'
    # hidden states are garbage by construction but never read downstream.
    for b in range(B):
        o_ref[b:b + 1, :] = x[b * S:b * S + 1, :]


# ---------------- wrapper (single pallas_call, single grid step) ----------------
def text_encoder_forward(input_ids, attention_mask, pk):
    """Equivalent of TextEncoder.forward: returns last_hidden_state[:, 0, :]."""
    ids_col = input_ids.reshape(B * S, 1).astype(jnp.int32)
    mask3 = attention_mask.reshape(B, 1, S).astype(jnp.int32)

    L = N_LAYERS
    c2 = lambda i: (0, 0)
    c3 = lambda i: (0, 0, 0)
    return pl.pallas_call(
        encoder_kernel,
        out_shape=jax.ShapeDtypeStruct((B, D), jnp.float32),
        grid=(1,),          # whole batch + all layers fused into one pipeline step
        in_specs=[
            pl.BlockSpec((B * S, 1), c2),          # token ids (int32)
            pl.BlockSpec((B, 1, S), c3),           # attention mask (int32)
            pl.BlockSpec((VOCAB, D), c2),          # word embedding table (f32, ~13 KB)
            pl.BlockSpec((MAX_POS, D), c2),        # position embedding table (f32)
            pl.BlockSpec((2, D), c2),              # embedding LN gamma/beta
            pl.BlockSpec((L, D, 3 * D), c3),       # packed QKV weights (bf16)
            pl.BlockSpec((L, 1, 3 * D), c3),       # packed QKV bias (f32, scale folded into Q)
            pl.BlockSpec((L, D, D), c3),           # attention out-proj (bf16)
            pl.BlockSpec((L, 6, D), c3),           # [bo, g1, b1, ffn_b2, g2, b2]
            pl.BlockSpec((L, D, FFN), c3),         # FFN lin1 (bf16)
            pl.BlockSpec((L, 1, FFN), c3),         # FFN lin1 bias (f32)
            pl.BlockSpec((L, FFN, D), c3),         # FFN lin2 (bf16)
        ],
        out_specs=pl.BlockSpec((B, D), c2),
        compiler_params=pltpu.CompilerParams(
            dimension_semantics=("arbitrary",),
            # TODO(synk): at real DistilBERT sizes, add a layer grid axis (index the
            # stacked weights by l, marked "arbitrary"), tile the sequence, and set
            # vmem_limit_bytes -- all-layers-resident overflows v7x's 64 MiB VMEM.
        ),
    )(ids_col, mask3, pk["word_emb"], pk["pos_emb"], pk["emb_ln"],
      pk["wqkv"], pk["bqkv"], pk["wo"], pk["dvec"], pk["w1"], pk["b1"], pk["w2"])


# ---------------- deterministic canonical parameter init (DistilBERT-like) ----------------
def init_params(key):
    keys = jax.random.split(key, 2 + N_LAYERS)
    params = {
        "word_emb": jax.random.normal(keys[0], (VOCAB, D), jnp.float32) * STD,
        "pos_emb": jax.random.normal(keys[1], (MAX_POS, D), jnp.float32) * STD,
        "emb_ln_g": jnp.ones((1, D), jnp.float32),
        "emb_ln_b": jnp.zeros((1, D), jnp.float32),
        "layers": [],
    }
    for li in range(N_LAYERS):
        lk = jax.random.split(keys[2 + li], 6)
        wq = jax.random.normal(lk[0], (D, D), jnp.float32) * STD
        wk = jax.random.normal(lk[1], (D, D), jnp.float32) * STD
        wv = jax.random.normal(lk[2], (D, D), jnp.float32) * STD
        wo = jax.random.normal(lk[3], (D, D), jnp.float32) * STD
        w1 = jax.random.normal(lk[4], (D, FFN), jnp.float32) * STD
        w2 = jax.random.normal(lk[5], (FFN, D), jnp.float32) * STD
        zD = jnp.zeros((1, D), jnp.float32)
        zF = jnp.zeros((1, FFN), jnp.float32)
        oD = jnp.ones((1, D), jnp.float32)
        params["layers"].append((
            wq, zD, wk, zD, wv, zD, wo, zD,    # q,k,v,o projections + biases
            oD, zD,                            # sa_layer_norm gamma/beta
            w1, zF, w2, zD,                    # FFN lin1/lin2 + biases
            oD, zD,                            # output_layer_norm gamma/beta
        ))
    return params


# ---------------- one-time packing / constant folding of kernel operands ----------------
def pack_params(params):
    # NOTE: folding 1/sqrt(HD) into BOTH Wq and bq is correct only because DistilBERT
    # scales q AFTER the bias add (q = q_lin(x) / sqrt(d)).
    scale = 1.0 / math.sqrt(HD)
    wqkv, bqkv, wo, w1, b1, w2, dvec = [], [], [], [], [], [], []
    for (wq, bq, wk, bk, wv, bv, wo_, bo, g1, be1, w1_, b1_, w2_, b2, g2, be2) in params["layers"]:
        wqkv.append(jnp.concatenate([wq * scale, wk, wv], axis=1))     # scale folded into Q cols
        bqkv.append(jnp.concatenate([bq * scale, bk, bv], axis=1))     # (1, 3D)
        wo.append(wo_)
        w1.append(w1_)
        b1.append(b1_)
        w2.append(w2_)
        dvec.append(jnp.concatenate([bo, g1, be1, b2, g2, be2], axis=0))   # (6, D)
    return {
        "word_emb": params["word_emb"],
        "pos_emb": params["pos_emb"],
        "emb_ln": jnp.concatenate([params["emb_ln_g"], params["emb_ln_b"]], axis=0),  # (2, D)
        "wqkv": jnp.stack(wqkv).astype(jnp.bfloat16),    # (L, D, 3D)
        "bqkv": jnp.stack(bqkv),                         # (L, 1, 3D) f32
        "wo":   jnp.stack(wo).astype(jnp.bfloat16),      # (L, D, D)
        "dvec": jnp.stack(dvec),                         # (L, 6, D) f32
        "w1":   jnp.stack(w1).astype(jnp.bfloat16),      # (L, D, FFN)
        "b1":   jnp.stack(b1),                           # (L, 1, FFN) f32
        "w2":   jnp.stack(w2).astype(jnp.bfloat16),      # (L, FFN, D)
    }


# ---------------- pure-JAX references ----------------
def ref_forward_packed(input_ids, attention_mask, pk):
    """Mirrors the kernel math closely (same packed bf16 weights) — tight check."""
    x = (jnp.take(pk["word_emb"], input_ids, axis=0)
         + pk["pos_emb"][jnp.arange(S)][None]).astype(jnp.float32)
    x = _ln(x, pk["emb_ln"][0:1], pk["emb_ln"][1:2])
    add_mask = ((1.0 - attention_mask.astype(jnp.float32)) * -1e9)[:, None, None, :]
    split = lambda t: t.reshape(B, S, H, HD).transpose(0, 2, 1, 3)
    for l in range(N_LAYERS):
        dv = pk["dvec"][l]
        qkv = jnp.einsum("bsd,de->bse", x.astype(jnp.bfloat16), pk["wqkv"][l],
                         preferred_element_type=jnp.float32) + pk["bqkv"][l]
        q, k, v = qkv[..., :D], qkv[..., D:2 * D], qkv[..., 2 * D:]
        s = jnp.einsum("bhqd,bhkd->bhqk", split(q), split(k)) + add_mask
        p = jax.nn.softmax(s, axis=-1)
        ctx = jnp.einsum("bhqk,bhkd->bhqd", p, split(v)).transpose(0, 2, 1, 3).reshape(B, S, D)
        attn = jnp.einsum("bsd,de->bse", ctx.astype(jnp.bfloat16), pk["wo"][l],
                          preferred_element_type=jnp.float32) + dv[0:1]
        h1 = _ln(x + attn, dv[1:2], dv[2:3])
        f = _gelu(jnp.einsum("bsd,df->bsf", h1.astype(jnp.bfloat16), pk["w1"][l],
                             preferred_element_type=jnp.float32) + pk["b1"][l])
        f = jnp.einsum("bsf,fd->bsd", f.astype(jnp.bfloat16), pk["w2"][l],
                       preferred_element_type=jnp.float32) + dv[3:4]
        x = _ln(h1 + f, dv[4:5], dv[5:6])
    return x[:, 0, :]


def ref_forward_f32(input_ids, attention_mask, params):
    """Independent full-precision reference on the unpacked weights — loose check."""
    x = (jnp.take(params["word_emb"], input_ids, axis=0)
         + params["pos_emb"][jnp.arange(S)][None]).astype(jnp.float32)
    x = _ln(x, params["emb_ln_g"], params["emb_ln_b"])
    add_mask = ((1.0 - attention_mask.astype(jnp.float32)) * -1e9)[:, None, None, :]
    split = lambda t: t.reshape(B, S, H, HD).transpose(0, 2, 1, 3)
    for (wq, bq, wk, bk, wv, bv, wo, bo, g1, be1, w1, b1, w2, b2, g2, be2) in params["layers"]:
        q, k, v = x @ wq + bq, x @ wk + bk, x @ wv + bv
        s = jnp.einsum("bhqd,bhkd->bhqk", split(q), split(k)) / math.sqrt(HD) + add_mask
        p = jax.nn.softmax(s, axis=-1)
        ctx = jnp.einsum("bhqk,bhkd->bhqd", p, split(v)).transpose(0, 2, 1, 3).reshape(B, S, D)
        h1 = _ln(x + ctx @ wo + bo, g1, be1)
        f = _gelu(h1 @ w1 + b1) @ w2 + b2
        x = _ln(h1 + f, g2, be2)
    return x[:, 0, :]


if __name__ == "__main__":
    key = jax.random.PRNGKey(0)
    pkey, ikey = jax.random.split(key)
    params = init_params(pkey)
    packed = pack_params(params)    # one-time packing / scale folding (not per-call work)

    input_ids = jax.random.randint(ikey, (B, S), 0, VOCAB, dtype=jnp.int32)
    attention_mask = jnp.ones((B, S), jnp.int32).at[1, 6:].set(0)   # pad last 2 tokens of batch 1

    out = text_encoder_forward(input_ids, attention_mask, packed)
    out = jax.block_until_ready(out)
    assert out.shape == (B, D), out.shape

    ref_tight = ref_forward_packed(input_ids, attention_mask, packed)
    err_tight = float(jnp.max(jnp.abs(out - ref_tight)))
    assert jnp.allclose(out, ref_tight, atol=2e-3, rtol=2e-3), err_tight

    ref_full = ref_forward_f32(input_ids, attention_mask, params)
    err_full = float(jnp.max(jnp.abs(out - ref_full)))
    assert jnp.allclose(out, ref_full, atol=1e-2, rtol=1e-2), err_full

    print("KERNEL_OK")
</pallas_src>

<mosaic_0001>
module attributes {stable_mosaic.version = 11 : i64} {
  func.func @encoder_kernel(%arg0: i32, %arg1: memref<16x1xi32, #tpu.memory_space<vmem>>, %arg2: memref<2x1x8xi32, #tpu.memory_space<vmem>>, %arg3: memref<100x32xf32, #tpu.memory_space<vmem>>, %arg4: memref<16x32xf32, #tpu.memory_space<vmem>>, %arg5: memref<2x32xf32, #tpu.memory_space<vmem>>, %arg6: memref<2x32x96xbf16, #tpu.memory_space<vmem>>, %arg7: memref<2x1x96xf32, #tpu.memory_space<vmem>>, %arg8: memref<2x32x32xbf16, #tpu.memory_space<vmem>>, %arg9: memref<2x6x32xf32, #tpu.memory_space<vmem>>, %arg10: memref<2x32x64xbf16, #tpu.memory_space<vmem>>, %arg11: memref<2x1x64xf32, #tpu.memory_space<vmem>>, %arg12: memref<2x64x32xbf16, #tpu.memory_space<vmem>>, %arg13: memref<2x32xf32, #tpu.memory_space<vmem>>) attributes {dimension_semantics = [#tpu.dimension_semantics<arbitrary>], iteration_bounds = array<i64: 1>, scalar_prefetch = 0 : i64, scratch_operands = 0 : i64, tpu.core_type = #tpu.core_type<tc>, window_params = [{pipeline_mode = #tpu.pipeline_mode<synchronous>, transform_indices = @transform_0, window_bounds = array<i64: 16, 1>}, {pipeline_mode = #tpu.pipeline_mode<synchronous>, transform_indices = @transform_1, window_bounds = array<i64: 2, 1, 8>}, {pipeline_mode = #tpu.pipeline_mode<synchronous>, transform_indices = @transform_2, window_bounds = array<i64: 100, 32>}, {pipeline_mode = #tpu.pipeline_mode<synchronous>, transform_indices = @transform_3, window_bounds = array<i64: 16, 32>}, {pipeline_mode = #tpu.pipeline_mode<synchronous>, transform_indices = @transform_4, window_bounds = array<i64: 2, 32>}, {pipeline_mode = #tpu.pipeline_mode<synchronous>, transform_indices = @transform_5, window_bounds = array<i64: 2, 32, 96>}, {pipeline_mode = #tpu.pipeline_mode<synchronous>, transform_indices = @transform_6, window_bounds = array<i64: 2, 1, 96>}, {pipeline_mode = #tpu.pipeline_mode<synchronous>, transform_indices = @transform_7, window_bounds = array<i64: 2, 32, 32>}, {pipeline_mode = #tpu.pipeline_mode<synchronous>, transform_indices = @transform_8, window_bounds = array<i64: 2, 6, 32>}, {pipeline_mode = #tpu.pipeline_mode<synchronous>, transform_indices = @transform_9, window_bounds = array<i64: 2, 32, 64>}, {pipeline_mode = #tpu.pipeline_mode<synchronous>, transform_indices = @transform_10, window_bounds = array<i64: 2, 1, 64>}, {pipeline_mode = #tpu.pipeline_mode<synchronous>, transform_indices = @transform_11, window_bounds = array<i64: 2, 64, 32>}, {pipeline_mode = #tpu.pipeline_mode<synchronous>, transform_indices = @transform_12, window_bounds = array<i64: 2, 32>}]} {
    %c0 = arith.constant 0 : index
    %c0_0 = arith.constant 0 : index
    %0 = vector.load %arg1[%c0, %c0_0] : memref<16x1xi32, #tpu.memory_space<vmem>>, vector<16x1xi32>
    %1 = tpu.iota {dimensions = array<i32: 1>} : vector<16x100xi32>
    %2 = vector.broadcast %0 : vector<16x1xi32> to vector<16x100xi32>
    %3 = arith.cmpi eq, %1, %2 : vector<16x100xi32>
    %4 = arith.extui %3 : vector<16x100xi1> to vector<16x100xi32>
    %5 = arith.sitofp %4 : vector<16x100xi32> to vector<16x100xf32>
    %c0_1 = arith.constant 0 : index
    %c0_2 = arith.constant 0 : index
    %6 = vector.load %arg3[%c0_1, %c0_2] : memref<100x32xf32, #tpu.memory_space<vmem>>, vector<100x32xf32>
    %cst = arith.constant dense<0.000000e+00> : vector<16x32xf32>
    %7 = tpu.matmul %5, %6, %cst {dimension_numbers = #tpu.dot_dimension_numbers<[1], [0], [0], [1], [0, 0, 1, 1], [], []>} : vector<16x100xf32>, vector<100x32xf32>, vector<16x32xf32> -> vector<16x32xf32>
    %8 = vector.shape_cast %7 : vector<16x32xf32> to vector<2x8x32xf32>
    %c0_3 = arith.constant 0 : index
    %c0_4 = arith.constant 0 : index
    %9 = vector.load %arg4[%c0_3, %c0_4] : memref<16x32xf32, #tpu.memory_space<vmem>>, vector<8x32xf32>
    %10 = vector.shape_cast %9 : vector<8x32xf32> to vector<1x8x32xf32>
    %11 = vector.broadcast %10 : vector<1x8x32xf32> to vector<2x8x32xf32>
    %12 = arith.addf %8, %11 : vector<2x8x32xf32>
    %13 = vector.shape_cast %12 : vector<2x8x32xf32> to vector<16x32xf32>
    %c0_5 = arith.constant 0 : index
    %c0_6 = arith.constant 0 : index
    %14 = vector.load %arg5[%c0_5, %c0_6] : memref<2x32xf32, #tpu.memory_space<vmem>>, vector<2x32xf32>
    %15 = vector.extract_strided_slice %14 {offsets = [0, 0], sizes = [1, 32], strides = [1, 1]} : vector<2x32xf32> to vector<1x32xf32>
    %16 = vector.extract_strided_slice %14 {offsets = [1, 0], sizes = [1, 32], strides = [1, 1]} : vector<2x32xf32> to vector<1x32xf32>
    %cst_7 = arith.constant dense<0.000000e+00> : vector<16xf32>
    %17 = vector.multi_reduction <add>, %13, %cst_7 [1] : vector<16x32xf32> to vector<16xf32>
    %18 = vector.shape_cast %17 : vector<16xf32> to vector<16x1xf32>
    %cst_8 = arith.constant 3.200000e+01 : f32
    %19 = vector.broadcast %cst_8 : f32 to vector<16x1xf32>
    %20 = arith.divf %18, %19 : vector<16x1xf32>
    %21 = vector.broadcast %20 : vector<16x1xf32> to vector<16x32xf32>
    %22 = arith.subf %13, %21 : vector<16x32xf32>
    %23 = arith.mulf %22, %22 : vector<16x32xf32>
    %cst_9 = arith.constant dense<0.000000e+00> : vector<16xf32>
    %24 = vector.multi_reduction <add>, %23, %cst_9 [1] : vector<16x32xf32> to vector<16xf32>
    %25 = vector.shape_cast %24 : vector<16xf32> to vector<16x1xf32>
    %cst_10 = arith.constant 3.200000e+01 : f32
    %26 = vector.broadcast %cst_10 : f32 to vector<16x1xf32>
    %27 = arith.divf %25, %26 : vector<16x1xf32>
    %28 = vector.broadcast %20 : vector<16x1xf32> to vector<16x32xf32>
    %29 = arith.subf %13, %28 : vector<16x32xf32>
    %cst_11 = arith.constant 9.99999996E-13 : f32
    %30 = vector.broadcast %cst_11 : f32 to vector<16x1xf32>
    %31 = arith.addf %27, %30 : vector<16x1xf32>
    %32 = math.rsqrt %31 : vector<16x1xf32>
    %33 = vector.broadcast %32 : vector<16x1xf32> to vector<16x32xf32>
    %34 = arith.mulf %29, %33 : vector<16x32xf32>
    %35 = vector.broadcast %15 : vector<1x32xf32> to vector<16x32xf32>
    %36 = arith.mulf %34, %35 : vector<16x32xf32>
    %37 = vector.broadcast %16 : vector<1x32xf32> to vector<16x32xf32>
    %38 = arith.addf %36, %37 : vector<16x32xf32>
    %c0_12 = arith.constant 0 : index
    %c0_13 = arith.constant 0 : index
    %c0_14 = arith.constant 0 : index
    %39 = vector.load %arg2[%c0_12, %c0_13, %c0_14] : memref<2x1x8xi32, #tpu.memory_space<vmem>>, vector<2x1x8xi32>
    %40 = arith.sitofp %39 : vector<2x1x8xi32> to vector<2x1x8xf32>
    %cst_15 = arith.constant 1.000000e+00 : f32
    %41 = vector.broadcast %cst_15 : f32 to vector<2x1x8xf32>
    %42 = arith.subf %41, %40 : vector<2x1x8xf32>
    %cst_16 = arith.constant -1.000000e+09 : f32
    %43 = vector.broadcast %cst_16 : f32 to vector<2x1x8xf32>
    %44 = arith.mulf %42, %43 : vector<2x1x8xf32>
    %c0_17 = arith.constant 0 : index
    %c0_18 = arith.constant 0 : index
    %c0_19 = arith.constant 0 : index
    %45 = vector.load %arg9[%c0_17, %c0_18, %c0_19] : memref<2x6x32xf32, #tpu.memory_space<vmem>>, vector<1x6x32xf32>
    %46 = vector.shape_cast %45 : vector<1x6x32xf32> to vector<6x32xf32>
    %c0_20 = arith.constant 0 : index
    %c0_21 = arith.constant 0 : index
    %c0_22 = arith.constant 0 : index
    %47 = vector.load %arg8[%c0_20, %c0_21, %c0_22] : memref<2x32x32xbf16, #tpu.memory_space<vmem>>, vector<1x32x32xbf16>
    %48 = vector.shape_cast %47 : vector<1x32x32xbf16> to vector<32x32xbf16>
    %49 = arith.truncf %38 : vector<16x32xf32> to vector<16x32xbf16>
    %c0_23 = arith.constant 0 : index
    %c0_24 = arith.constant 0 : index
    %c0_25 = arith.constant 0 : index
    %50 = vector.load %arg6[%c0_23, %c0_24, %c0_25] : memref<2x32x96xbf16, #tpu.memory_space<vmem>>, vector<1x32x96xbf16>
    %51 = vector.shape_cast %50 : vector<1x32x96xbf16> to vector<32x96xbf16>
    %cst_26 = arith.constant dense<0.000000e+00> : vector<16x96xf32>
    %52 = tpu.matmul %49, %51, %cst_26 {dimension_numbers = #tpu.dot_dimension_numbers<[1], [0], [0], [1], [0, 0, 1, 1], [], []>} : vector<16x32xbf16>, vector<32x96xbf16>, vector<16x96xf32> -> vector<16x96xf32>
    %c0_27 = arith.constant 0 : index
    %c0_28 = arith.constant 0 : index
    %c0_29 = arith.constant 0 : index
    %53 = vector.load %arg7[%c0_27, %c0_28, %c0_29] : memref<2x1x96xf32, #tpu.memory_space<vmem>>, vector<1x1x96xf32>
    %54 = vector.shape_cast %53 : vector<1x1x96xf32> to vector<1x96xf32>
    %55 = vector.broadcast %54 : vector<1x96xf32> to vector<16x96xf32>
    %56 = arith.addf %52, %55 : vector<16x96xf32>
    %57 = vector.shape_cast %56 : vector<16x96xf32> to vector<2x8x96xf32>
    %cst_30 = arith.constant 0.000000e+00 : f32
    %58 = vector.broadcast %cst_30 : f32 to vector<16x32xf32>
    %59 = vector.extract_strided_slice %57 {offsets = [0, 0, 0], sizes = [2, 8, 8], strides = [1, 1, 1]} : vector<2x8x96xf32> to vector<2x8x8xf32>
    %60 = vector.extract_strided_slice %57 {offsets = [0, 0, 32], sizes = [2, 8, 8], strides = [1, 1, 1]} : vector<2x8x96xf32> to vector<2x8x8xf32>
    %61 = vector.extract_strided_slice %57 {offsets = [0, 0, 64], sizes = [2, 8, 8], strides = [1, 1, 1]} : vector<2x8x96xf32> to vector<2x8x8xf32>
    "tpu.trace_start"() <{level = 10 : i32, message = "bqh,bkh->bqk"}> : () -> ()
    %cst_31 = arith.constant dense<0.000000e+00> : vector<2x8x8xf32>
    %62 = tpu.matmul %59, %60, %cst_31 {dimension_numbers = #tpu.dot_dimension_numbers<[2], [2], [1], [1], [0, 0, 0, 1, 1, 1], [0], [0]>} : vector<2x8x8xf32>, vector<2x8x8xf32>, vector<2x8x8xf32> -> vector<2x8x8xf32>
    "tpu.trace_stop"() : () -> ()
    %63 = vector.broadcast %44 : vector<2x1x8xf32> to vector<2x8x8xf32>
    %64 = arith.addf %62, %63 : vector<2x8x8xf32>
    %cst_32 = arith.constant dense<0xFF800000> : vector<2x8xf32>
    %65 = vector.multi_reduction <maximumf>, %64, %cst_32 [2] : vector<2x8x8xf32> to vector<2x8xf32>
    %66 = vector.shape_cast %65 : vector<2x8xf32> to vector<2x8x1xf32>
    %67 = vector.broadcast %66 : vector<2x8x1xf32> to vector<2x8x8xf32>
    %68 = arith.subf %64, %67 : vector<2x8x8xf32>
    %69 = math.exp %68 : vector<2x8x8xf32>
    %cst_33 = arith.constant dense<0.000000e+00> : vector<2x8xf32>
    %70 = vector.multi_reduction <add>, %69, %cst_33 [2] : vector<2x8x8xf32> to vector<2x8xf32>
    %71 = vector.shape_cast %70 : vector<2x8xf32> to vector<2x8x1xf32>
    %72 = tpu.reciprocal %71 {approx = true} : vector<2x8x1xf32> -> vector<2x8x1xf32>
    %73 = vector.broadcast %72 : vector<2x8x1xf32> to vector<2x8x8xf32>
    %74 = arith.mulf %69, %73 : vector<2x8x8xf32>
    "tpu.trace_start"() <{level = 10 : i32, message = "bqk,bkh->bqh"}> : () -> ()
    %cst_34 = arith.constant dense<0.000000e+00> : vector<2x8x8xf32>
    %75 = tpu.matmul %74, %61, %cst_34 {dimension_numbers = #tpu.dot_dimension_numbers<[2], [1], [1], [2], [0, 0, 0, 1, 1, 2], [0], [0]>} : vector<2x8x8xf32>, vector<2x8x8xf32>, vector<2x8x8xf32> -> vector<2x8x8xf32>
    "tpu.trace_stop"() : () -> ()
    %76 = vector.shape_cast %75 : vector<2x8x8xf32> to vector<16x8xf32>
    %77 = arith.truncf %76 : vector<16x8xf32> to vector<16x8xbf16>
    %78 = vector.extract_strided_slice %48 {offsets = [0, 0], sizes = [8, 32], strides = [1, 1]} : vector<32x32xbf16> to vector<8x32xbf16>
    %cst_35 = arith.constant dense<0.000000e+00> : vector<16x32xf32>
    %79 = tpu.matmul %77, %78, %cst_35 {dimension_numbers = #tpu.dot_dimension_numbers<[1], [0], [0], [1], [0, 0, 1, 1], [], []>} : vector<16x8xbf16>, vector<8x32xbf16>, vector<16x32xf32> -> vector<16x32xf32>
    %80 = arith.addf %58, %79 : vector<16x32xf32>
    %81 = vector.extract_strided_slice %57 {offsets = [0, 0, 8], sizes = [2, 8, 8], strides = [1, 1, 1]} : vector<2x8x96xf32> to vector<2x8x8xf32>
    %82 = vector.extract_strided_slice %57 {offsets = [0, 0, 40], sizes = [2, 8, 8], strides = [1, 1, 1]} : vector<2x8x96xf32> to vector<2x8x8xf32>
    %83 = vector.extract_strided_slice %57 {offsets = [0, 0, 72], sizes = [2, 8, 8], strides = [1, 1, 1]} : vector<2x8x96xf32> to vector<2x8x8xf32>
    "tpu.trace_start"() <{level = 10 : i32, message = "bqh,bkh->bqk"}> : () -> ()
    %cst_36 = arith.constant dense<0.000000e+00> : vector<2x8x8xf32>
    %84 = tpu.matmul %81, %82, %cst_36 {dimension_numbers = #tpu.dot_dimension_numbers<[2], [2], [1], [1], [0, 0, 0, 1, 1, 1], [0], [0]>} : vector<2x8x8xf32>, vector<2x8x8xf32>, vector<2x8x8xf32> -> vector<2x8x8xf32>
    "tpu.trace_stop"() : () -> ()
    %85 = vector.broadcast %44 : vector<2x1x8xf32> to vector<2x8x8xf32>
    %86 = arith.addf %84, %85 : vector<2x8x8xf32>
    %cst_37 = arith.constant dense<0xFF800000> : vector<2x8xf32>
    %87 = vector.multi_reduction <maximumf>, %86, %cst_37 [2] : vector<2x8x8xf32> to vector<2x8xf32>
    %88 = vector.shape_cast %87 : vector<2x8xf32> to vector<2x8x1xf32>
    %89 = vector.broadcast %88 : vector<2x8x1xf32> to vector<2x8x8xf32>
    %90 = arith.subf %86, %89 : vector<2x8x8xf32>
    %91 = math.exp %90 : vector<2x8x8xf32>
    %cst_38 = arith.constant dense<0.000000e+00> : vector<2x8xf32>
    %92 = vector.multi_reduction <add>, %91, %cst_38 [2] : vector<2x8x8xf32> to vector<2x8xf32>
    %93 = vector.shape_cast %92 : vector<2x8xf32> to vector<2x8x1xf32>
    %94 = tpu.reciprocal %93 {approx = true} : vector<2x8x1xf32> -> vector<2x8x1xf32>
    %95 = vector.broadcast %94 : vector<2x8x1xf32> to vector<2x8x8xf32>
    %96 = arith.mulf %91, %95 : vector<2x8x8xf32>
    "tpu.trace_start"() <{level = 10 : i32, message = "bqk,bkh->bqh"}> : () -> ()
    %cst_39 = arith.constant dense<0.000000e+00> : vector<2x8x8xf32>
    %97 = tpu.matmul %96, %83, %cst_39 {dimension_numbers = #tpu.dot_dimension_numbers<[2], [1], [1], [2], [0, 0, 0, 1, 1, 2], [0], [0]>} : vector<2x8x8xf32>, vector<2x8x8xf32>, vector<2x8x8xf32> -> vector<2x8x8xf32>
    "tpu.trace_stop"() : () -> ()
    %98 = vector.shape_cast %97 : vector<2x8x8xf32> to vector<16x8xf32>
    %99 = arith.truncf %98 : vector<16x8xf32> to vector<16x8xbf16>
    %100 = vector.extract_strided_slice %48 {offsets = [8, 0], sizes = [8, 32], strides = [1, 1]} : vector<32x32xbf16> to vector<8x32xbf16>
    %cst_40 = arith.constant dense<0.000000e+00> : vector<16x32xf32>
    %101 = tpu.matmul %99, %100, %cst_40 {dimension_numbers = #tpu.dot_dimension_numbers<[1], [0], [0], [1], [0, 0, 1, 1], [], []>} : vector<16x8xbf16>, vector<8x32xbf16>, vector<16x32xf32> -> vector<16x32xf32>
    %102 = arith.addf %80, %101 : vector<16x32xf32>
    %103 = vector.extract_strided_slice %57 {offsets = [0, 0, 16], sizes = [2, 8, 8], strides = [1, 1, 1]} : vector<2x8x96xf32> to vector<2x8x8xf32>
    %104 = vector.extract_strided_slice %57 {offsets = [0, 0, 48], sizes = [2, 8, 8], strides = [1, 1, 1]} : vector<2x8x96xf32> to vector<2x8x8xf32>
    %105 = vector.extract_strided_slice %57 {offsets = [0, 0, 80], sizes = [2, 8, 8], strides = [1, 1, 1]} : vector<2x8x96xf32> to vector<2x8x8xf32>
    "tpu.trace_start"() <{level = 10 : i32, message = "bqh,bkh->bqk"}> : () -> ()
    %cst_41 = arith.constant dense<0.000000e+00> : vector<2x8x8xf32>
    %106 = tpu.matmul %103, %104, %cst_41 {dimension_numbers = #tpu.dot_dimension_numbers<[2], [2], [1], [1], [0, 0, 0, 1, 1, 1], [0], [0]>} : vector<2x8x8xf32>, vector<2x8x8xf32>, vector<2x8x8xf32> -> vector<2x8x8xf32>
    "tpu.trace_stop"() : () -> ()
    %107 = vector.broadcast %44 : vector<2x1x8xf32> to vector<2x8x8xf32>
    %108 = arith.addf %106, %107 : vector<2x8x8xf32>
    %cst_42 = arith.constant dense<0xFF800000> : vector<2x8xf32>
    %109 = vector.multi_reduction <maximumf>, %108, %cst_42 [2] : vector<2x8x8xf32> to vector<2x8xf32>
    %110 = vector.shape_cast %109 : vector<2x8xf32> to vector<2x8x1xf32>
    %111 = vector.broadcast %110 : vector<2x8x1xf32> to vector<2x8x8xf32>
    %112 = arith.subf %108, %111 : vector<2x8x8xf32>
    %113 = math.exp %112 : vector<2x8x8xf32>
    %cst_43 = arith.constant dense<0.000000e+00> : vector<2x8xf32>
    %114 = vector.multi_reduction <add>, %113, %cst_43 [2] : vector<2x8x8xf32> to vector<2x8xf32>
    %115 = vector.shape_cast %114 : vector<2x8xf32> to vector<2x8x1xf32>
    %116 = tpu.reciprocal %115 {approx = true} : vector<2x8x1xf32> -> vector<2x8x1xf32>
    %117 = vector.broadcast %116 : vector<2x8x1xf32> to vector<2x8x8xf32>
    %118 = arith.mulf %113, %117 : vector<2x8x8xf32>
    "tpu.trace_start"() <{level = 10 : i32, message = "bqk,bkh->bqh"}> : () -> ()
    %cst_44 = arith.constant dense<0.000000e+00> : vector<2x8x8xf32>
    %119 = tpu.matmul %118, %105, %cst_44 {dimension_numbers = #tpu.dot_dimension_numbers<[2], [1], [1], [2], [0, 0, 0, 1, 1, 2], [0], [0]>} : vector<2x8x8xf32>, vector<2x8x8xf32>, vector<2x8x8xf32> -> vector<2x8x8xf32>
    "tpu.trace_stop"() : () -> ()
    %120 = vector.shape_cast %119 : vector<2x8x8xf32> to vector<16x8xf32>
    %121 = arith.truncf %120 : vector<16x8xf32> to vector<16x8xbf16>
    %122 = vector.extract_strided_slice %48 {offsets = [16, 0], sizes = [8, 32], strides = [1, 1]} : vector<32x32xbf16> to vector<8x32xbf16>
    %cst_45 = arith.constant dense<0.000000e+00> : vector<16x32xf32>
    %123 = tpu.matmul %121, %122, %cst_45 {dimension_numbers = #tpu.dot_dimension_numbers<[1], [0], [0], [1], [0, 0, 1, 1], [], []>} : vector<16x8xbf16>, vector<8x32xbf16>, vector<16x32xf32> -> vector<16x32xf32>
    %124 = arith.addf %102, %123 : vector<16x32xf32>
    %125 = vector.extract_strided_slice %57 {offsets = [0, 0, 24], sizes = [2, 8, 8], strides = [1, 1, 1]} : vector<2x8x96xf32> to vector<2x8x8xf32>
    %126 = vector.extract_strided_slice %57 {offsets = [0, 0, 56], sizes = [2, 8, 8], strides = [1, 1, 1]} : vector<2x8x96xf32> to vector<2x8x8xf32>
    %127 = vector.extract_strided_slice %57 {offsets = [0, 0, 88], sizes = [2, 8, 8], strides = [1, 1, 1]} : vector<2x8x96xf32> to vector<2x8x8xf32>
    "tpu.trace_start"() <{level = 10 : i32, message = "bqh,bkh->bqk"}> : () -> ()
    %cst_46 = arith.constant dense<0.000000e+00> : vector<2x8x8xf32>
    %128 = tpu.matmul %125, %126, %cst_46 {dimension_numbers = #tpu.dot_dimension_numbers<[2], [2], [1], [1], [0, 0, 0, 1, 1, 1], [0], [0]>} : vector<2x8x8xf32>, vector<2x8x8xf32>, vector<2x8x8xf32> -> vector<2x8x8xf32>
    "tpu.trace_stop"() : () -> ()
    %129 = vector.broadcast %44 : vector<2x1x8xf32> to vector<2x8x8xf32>
    %130 = arith.addf %128, %129 : vector<2x8x8xf32>
    %cst_47 = arith.constant dense<0xFF800000> : vector<2x8xf32>
    %131 = vector.multi_reduction <maximumf>, %130, %cst_47 [2] : vector<2x8x8xf32> to vector<2x8xf32>
    %132 = vector.shape_cast %131 : vector<2x8xf32> to vector<2x8x1xf32>
    %133 = vector.broadcast %132 : vector<2x8x1xf32> to vector<2x8x8xf32>
    %134 = arith.subf %130, %133 : vector<2x8x8xf32>
    %135 = math.exp %134 : vector<2x8x8xf32>
    %cst_48 = arith.constant dense<0.000000e+00> : vector<2x8xf32>
    %136 = vector.multi_reduction <add>, %135, %cst_48 [2] : vector<2x8x8xf32> to vector<2x8xf32>
    %137 = vector.shape_cast %136 : vector<2x8xf32> to vector<2x8x1xf32>
    %138 = tpu.reciprocal %137 {approx = true} : vector<2x8x1xf32> -> vector<2x8x1xf32>
    %139 = vector.broadcast %138 : vector<2x8x1xf32> to vector<2x8x8xf32>
    %140 = arith.mulf %135, %139 : vector<2x8x8xf32>
    "tpu.trace_start"() <{level = 10 : i32, message = "bqk,bkh->bqh"}> : () -> ()
    %cst_49 = arith.constant dense<0.000000e+00> : vector<2x8x8xf32>
    %141 = tpu.matmul %140, %127, %cst_49 {dimension_numbers = #tpu.dot_dimension_numbers<[2], [1], [1], [2], [0, 0, 0, 1, 1, 2], [0], [0]>} : vector<2x8x8xf32>, vector<2x8x8xf32>, vector<2x8x8xf32> -> vector<2x8x8xf32>
    "tpu.trace_stop"() : () -> ()
    %142 = vector.shape_cast %141 : vector<2x8x8xf32> to vector<16x8xf32>
    %143 = arith.truncf %142 : vector<16x8xf32> to vector<16x8xbf16>
    %144 = vector.extract_strided_slice %48 {offsets = [24, 0], sizes = [8, 32], strides = [1, 1]} : vector<32x32xbf16> to vector<8x32xbf16>
    %cst_50 = arith.constant dense<0.000000e+00> : vector<16x32xf32>
    %145 = tpu.matmul %143, %144, %cst_50 {dimension_numbers = #tpu.dot_dimension_numbers<[1], [0], [0], [1], [0, 0, 1, 1], [], []>} : vector<16x8xbf16>, vector<8x32xbf16>, vector<16x32xf32> -> vector<16x32xf32>
    %146 = arith.addf %124, %145 : vector<16x32xf32>
    %147 = arith.addf %38, %146 : vector<16x32xf32>
    %148 = vector.extract_strided_slice %46 {offsets = [0, 0], sizes = [1, 32], strides = [1, 1]} : vector<6x32xf32> to vector<1x32xf32>
    %149 = vector.broadcast %148 : vector<1x32xf32> to vector<16x32xf32>
    %150 = arith.addf %147, %149 : vector<16x32xf32>
    %151 = vector.extract_strided_slice %46 {offsets = [1, 0], sizes = [1, 32], strides = [1, 1]} : vector<6x32xf32> to vector<1x32xf32>
    %152 = vector.extract_strided_slice %46 {offsets = [2, 0], sizes = [1, 32], strides = [1, 1]} : vector<6x32xf32> to vector<1x32xf32>
    %cst_51 = arith.constant dense<0.000000e+00> : vector<16xf32>
    %153 = vector.multi_reduction <add>, %150, %cst_51 [1] : vector<16x32xf32> to vector<16xf32>
    %154 = vector.shape_cast %153 : vector<16xf32> to vector<16x1xf32>
    %cst_52 = arith.constant 3.200000e+01 : f32
    %155 = vector.broadcast %cst_52 : f32 to vector<16x1xf32>
    %156 = arith.divf %154, %155 : vector<16x1xf32>
    %157 = vector.broadcast %156 : vector<16x1xf32> to vector<16x32xf32>
    %158 = arith.subf %150, %157 : vector<16x32xf32>
    %159 = arith.mulf %158, %158 : vector<16x32xf32>
    %cst_53 = arith.constant dense<0.000000e+00> : vector<16xf32>
    %160 = vector.multi_reduction <add>, %159, %cst_53 [1] : vector<16x32xf32> to vector<16xf32>
    %161 = vector.shape_cast %160 : vector<16xf32> to vector<16x1xf32>
    %cst_54 = arith.constant 3.200000e+01 : f32
    %162 = vector.broadcast %cst_54 : f32 to vector<16x1xf32>
    %163 = arith.divf %161, %162 : vector<16x1xf32>
    %164 = vector.broadcast %156 : vector<16x1xf32> to vector<16x32xf32>
    %165 = arith.subf %150, %164 : vector<16x32xf32>
    %cst_55 = arith.constant 9.99999996E-13 : f32
    %166 = vector.broadcast %cst_55 : f32 to vector<16x1xf32>
    %167 = arith.addf %163, %166 : vector<16x1xf32>
    %168 = math.rsqrt %167 : vector<16x1xf32>
    %169 = vector.broadcast %168 : vector<16x1xf32> to vector<16x32xf32>
    %170 = arith.mulf %165, %169 : vector<16x32xf32>
    %171 = vector.broadcast %151 : vector<1x32xf32> to vector<16x32xf32>
    %172 = arith.mulf %170, %171 : vector<16x32xf32>
    %173 = vector.broadcast %152 : vector<1x32xf32> to vector<16x32xf32>
    %174 = arith.addf %172, %173 : vector<16x32xf32>
    %175 = arith.truncf %174 : vector<16x32xf32> to vector<16x32xbf16>
    %c0_56 = arith.constant 0 : index
    %c0_57 = arith.constant 0 : index
    %c0_58 = arith.constant 0 : index
    %176 = vector.load %arg10[%c0_56, %c0_57, %c0_58] : memref<2x32x64xbf16, #tpu.memory_space<vmem>>, vector<1x32x64xbf16>
    %177 = vector.shape_cast %176 : vector<1x32x64xbf16> to vector<32x64xbf16>
    %cst_59 = arith.constant dense<0.000000e+00> : vector<16x64xf32>
    %178 = tpu.matmul %175, %177, %cst_59 {dimension_numbers = #tpu.dot_dimension_numbers<[1], [0], [0], [1], [0, 0, 1, 1], [], []>} : vector<16x32xbf16>, vector<32x64xbf16>, vector<16x64xf32> -> vector<16x64xf32>
    %c0_60 = arith.constant 0 : index
    %c0_61 = arith.constant 0 : index
    %c0_62 = arith.constant 0 : index
    %179 = vector.load %arg11[%c0_60, %c0_61, %c0_62] : memref<2x1x64xf32, #tpu.memory_space<vmem>>, vector<1x1x64xf32>
    %180 = vector.shape_cast %179 : vector<1x1x64xf32> to vector<1x64xf32>
    %181 = vector.broadcast %180 : vector<1x64xf32> to vector<16x64xf32>
    %182 = arith.addf %178, %181 : vector<16x64xf32>
    %cst_63 = arith.constant 5.000000e-01 : f32
    %183 = vector.broadcast %cst_63 : f32 to vector<16x64xf32>
    %184 = arith.mulf %183, %182 : vector<16x64xf32>
    %cst_64 = arith.constant 0.707106769 : f32
    %185 = vector.broadcast %cst_64 : f32 to vector<16x64xf32>
    %186 = arith.mulf %182, %185 : vector<16x64xf32>
    %cst_65 = arith.constant 0.000000e+00 : f32
    %187 = vector.broadcast %cst_65 : f32 to vector<16x64xf32>
    %188 = arith.cmpf oge, %186, %187 : vector<16x64xf32>
    %cst_66 = arith.constant 1.000000e+00 : f32
    %cst_67 = arith.constant -1.000000e+00 : f32
    %189 = vector.broadcast %cst_66 : f32 to vector<16x64xf32>
    %190 = vector.broadcast %cst_67 : f32 to vector<16x64xf32>
    %191 = arith.select %188, %189, %190 : vector<16x64xi1>, vector<16x64xf32>
    %192 = math.absf %186 : vector<16x64xf32>
    %cst_68 = arith.constant 0.327591091 : f32
    %193 = vector.broadcast %cst_68 : f32 to vector<16x64xf32>
    %194 = arith.mulf %193, %192 : vector<16x64xf32>
    %cst_69 = arith.constant 1.000000e+00 : f32
    %195 = vector.broadcast %cst_69 : f32 to vector<16x64xf32>
    %196 = arith.addf %195, %194 : vector<16x64xf32>
    %197 = tpu.reciprocal %196 {approx = true} : vector<16x64xf32> -> vector<16x64xf32>
    %cst_70 = arith.constant 1.06140542 : f32
    %198 = vector.broadcast %cst_70 : f32 to vector<16x64xf32>
    %199 = arith.mulf %198, %197 : vector<16x64xf32>
    %cst_71 = arith.constant -1.45315206 : f32
    %200 = vector.broadcast %cst_71 : f32 to vector<16x64xf32>
    %201 = arith.addf %199, %200 : vector<16x64xf32>
    %202 = arith.mulf %201, %197 : vector<16x64xf32>
    %cst_72 = arith.constant 1.42141378 : f32
    %203 = vector.broadcast %cst_72 : f32 to vector<16x64xf32>
    %204 = arith.addf %202, %203 : vector<16x64xf32>
    %205 = arith.mulf %204, %197 : vector<16x64xf32>
    %cst_73 = arith.constant -0.284496725 : f32
    %206 = vector.broadcast %cst_73 : f32 to vector<16x64xf32>
    %207 = arith.addf %205, %206 : vector<16x64xf32>
    %208 = arith.mulf %207, %197 : vector<16x64xf32>
    %cst_74 = arith.constant 0.254829586 : f32
    %209 = vector.broadcast %cst_74 : f32 to vector<16x64xf32>
    %210 = arith.addf %208, %209 : vector<16x64xf32>
    %211 = arith.mulf %210, %197 : vector<16x64xf32>
    %cst_75 = arith.constant 0.000000e+00 : f32
    %212 = vector.broadcast %cst_75 : f32 to vector<16x64xf32>
    %213 = arith.subf %212, %192 : vector<16x64xf32>
    %214 = arith.mulf %213, %192 : vector<16x64xf32>
    %215 = math.exp %214 : vector<16x64xf32>
    %216 = arith.mulf %211, %215 : vector<16x64xf32>
    %cst_76 = arith.constant 1.000000e+00 : f32
    %217 = vector.broadcast %cst_76 : f32 to vector<16x64xf32>
    %218 = arith.subf %217, %216 : vector<16x64xf32>
    %219 = arith.mulf %191, %218 : vector<16x64xf32>
    %cst_77 = arith.constant 1.000000e+00 : f32
    %220 = vector.broadcast %cst_77 : f32 to vector<16x64xf32>
    %221 = arith.addf %220, %219 : vector<16x64xf32>
    %222 = arith.mulf %184, %221 : vector<16x64xf32>
    %223 = arith.truncf %222 : vector<16x64xf32> to vector<16x64xbf16>
    %c0_78 = arith.constant 0 : index
    %c0_79 = arith.constant 0 : index
    %c0_80 = arith.constant 0 : index
    %224 = vector.load %arg12[%c0_78, %c0_79, %c0_80] : memref<2x64x32xbf16, #tpu.memory_space<vmem>>, vector<1x64x32xbf16>
    %225 = vector.shape_cast %224 : vector<1x64x32xbf16> to vector<64x32xbf16>
    %cst_81 = arith.constant dense<0.000000e+00> : vector<16x32xf32>
    %226 = tpu.matmul %223, %225, %cst_81 {dimension_numbers = #tpu.dot_dimension_numbers<[1], [0], [0], [1], [0, 0, 1, 1], [], []>} : vector<16x64xbf16>, vector<64x32xbf16>, vector<16x32xf32> -> vector<16x32xf32>
    %227 = vector.extract_strided_slice %46 {offsets = [3, 0], sizes = [1, 32], strides = [1, 1]} : vector<6x32xf32> to vector<1x32xf32>
    %228 = vector.broadcast %227 : vector<1x32xf32> to vector<16x32xf32>
    %229 = arith.addf %226, %228 : vector<16x32xf32>
    %230 = arith.addf %174, %229 : vector<16x32xf32>
    %231 = vector.extract_strided_slice %46 {offsets = [4, 0], sizes = [1, 32], strides = [1, 1]} : vector<6x32xf32> to vector<1x32xf32>
    %232 = vector.extract_strided_slice %46 {offsets = [5, 0], sizes = [1, 32], strides = [1, 1]} : vector<6x32xf32> to vector<1x32xf32>
    %cst_82 = arith.constant dense<0.000000e+00> : vector<16xf32>
    %233 = vector.multi_reduction <add>, %230, %cst_82 [1] : vector<16x32xf32> to vector<16xf32>
    %234 = vector.shape_cast %233 : vector<16xf32> to vector<16x1xf32>
    %cst_83 = arith.constant 3.200000e+01 : f32
    %235 = vector.broadcast %cst_83 : f32 to vector<16x1xf32>
    %236 = arith.divf %234, %235 : vector<16x1xf32>
    %237 = vector.broadcast %236 : vector<16x1xf32> to vector<16x32xf32>
    %238 = arith.subf %230, %237 : vector<16x32xf32>
    %239 = arith.mulf %238, %238 : vector<16x32xf32>
    %cst_84 = arith.constant dense<0.000000e+00> : vector<16xf32>
    %240 = vector.multi_reduction <add>, %239, %cst_84 [1] : vector<16x32xf32> to vector<16xf32>
    %241 = vector.shape_cast %240 : vector<16xf32> to vector<16x1xf32>
    %cst_85 = arith.constant 3.200000e+01 : f32
    %242 = vector.broadcast %cst_85 : f32 to vector<16x1xf32>
    %243 = arith.divf %241, %242 : vector<16x1xf32>
    %244 = vector.broadcast %236 : vector<16x1xf32> to vector<16x32xf32>
    %245 = arith.subf %230, %244 : vector<16x32xf32>
    %cst_86 = arith.constant 9.99999996E-13 : f32
    %246 = vector.broadcast %cst_86 : f32 to vector<16x1xf32>
    %247 = arith.addf %243, %246 : vector<16x1xf32>
    %248 = math.rsqrt %247 : vector<16x1xf32>
    %249 = vector.broadcast %248 : vector<16x1xf32> to vector<16x32xf32>
    %250 = arith.mulf %245, %249 : vector<16x32xf32>
    %251 = vector.broadcast %231 : vector<1x32xf32> to vector<16x32xf32>
    %252 = arith.mulf %250, %251 : vector<16x32xf32>
    %253 = vector.broadcast %232 : vector<1x32xf32> to vector<16x32xf32>
    %254 = arith.addf %252, %253 : vector<16x32xf32>
    %c1 = arith.constant 1 : index
    %c0_87 = arith.constant 0 : index
    %c0_88 = arith.constant 0 : index
    %255 = vector.load %arg9[%c1, %c0_87, %c0_88] : memref<2x6x32xf32, #tpu.memory_space<vmem>>, vector<1x6x32xf32>
    %256 = vector.shape_cast %255 : vector<1x6x32xf32> to vector<6x32xf32>
    %c1_89 = arith.constant 1 : index
    %c0_90 = arith.constant 0 : index
    %c0_91 = arith.constant 0 : index
    %257 = vector.load %arg8[%c1_89, %c0_90, %c0_91] : memref<2x32x32xbf16, #tpu.memory_space<vmem>>, vector<1x32x32xbf16>
    %258 = vector.shape_cast %257 : vector<1x32x32xbf16> to vector<32x32xbf16>
    %259 = arith.truncf %254 : vector<16x32xf32> to vector<16x32xbf16>
    %c1_92 = arith.constant 1 : index
    %c0_93 = arith.constant 0 : index
    %c0_94 = arith.constant 0 : index
    %260 = vector.load %arg6[%c1_92, %c0_93, %c0_94] : memref<2x32x96xbf16, #tpu.memory_space<vmem>>, vector<1x32x96xbf16>
    %261 = vector.shape_cast %260 : vector<1x32x96xbf16> to vector<32x96xbf16>
    %cst_95 = arith.constant dense<0.000000e+00> : vector<16x96xf32>
    %262 = tpu.matmul %259, %261, %cst_95 {dimension_numbers = #tpu.dot_dimension_numbers<[1], [0], [0], [1], [0, 0, 1, 1], [], []>} : vector<16x32xbf16>, vector<32x96xbf16>, vector<16x96xf32> -> vector<16x96xf32>
    %c1_96 = arith.constant 1 : index
    %c0_97 = arith.constant 0 : index
    %c0_98 = arith.constant 0 : index
    %263 = vector.load %arg7[%c1_96, %c0_97, %c0_98] : memref<2x1x96xf32, #tpu.memory_space<vmem>>, vector<1x1x96xf32>
    %264 = vector.shape_cast %263 : vector<1x1x96xf32> to vector<1x96xf32>
    %265 = vector.broadcast %264 : vector<1x96xf32> to vector<16x96xf32>
    %266 = arith.addf %262, %265 : vector<16x96xf32>
    %267 = vector.shape_cast %266 : vector<16x96xf32> to vector<2x8x96xf32>
    %cst_99 = arith.constant 0.000000e+00 : f32
    %268 = vector.broadcast %cst_99 : f32 to vector<16x32xf32>
    %269 = vector.extract_strided_slice %267 {offsets = [0, 0, 0], sizes = [2, 8, 8], strides = [1, 1, 1]} : vector<2x8x96xf32> to vector<2x8x8xf32>
    %270 = vector.extract_strided_slice %267 {offsets = [0, 0, 32], sizes = [2, 8, 8], strides = [1, 1, 1]} : vector<2x8x96xf32> to vector<2x8x8xf32>
    %271 = vector.extract_strided_slice %267 {offsets = [0, 0, 64], sizes = [2, 8, 8], strides = [1, 1, 1]} : vector<2x8x96xf32> to vector<2x8x8xf32>
    "tpu.trace_start"() <{level = 10 : i32, message = "bqh,bkh->bqk"}> : () -> ()
    %cst_100 = arith.constant dense<0.000000e+00> : vector<2x8x8xf32>
    %272 = tpu.matmul %269, %270, %cst_100 {dimension_numbers = #tpu.dot_dimension_numbers<[2], [2], [1], [1], [0, 0, 0, 1, 1, 1], [0], [0]>} : vector<2x8x8xf32>, vector<2x8x8xf32>, vector<2x8x8xf32> -> vector<2x8x8xf32>
    "tpu.trace_stop"() : () -> ()
    %273 = vector.broadcast %44 : vector<2x1x8xf32> to vector<2x8x8xf32>
    %274 = arith.addf %272, %273 : vector<2x8x8xf32>
    %cst_101 = arith.constant dense<0xFF800000> : vector<2x8xf32>
    %275 = vector.multi_reduction <maximumf>, %274, %cst_101 [2] : vector<2x8x8xf32> to vector<2x8xf32>
    %276 = vector.shape_cast %275 : vector<2x8xf32> to vector<2x8x1xf32>
    %277 = vector.broadcast %276 : vector<2x8x1xf32> to vector<2x8x8xf32>
    %278 = arith.subf %274, %277 : vector<2x8x8xf32>
    %279 = math.exp %278 : vector<2x8x8xf32>
    %cst_102 = arith.constant dense<0.000000e+00> : vector<2x8xf32>
    %280 = vector.multi_reduction <add>, %279, %cst_102 [2] : vector<2x8x8xf32> to vector<2x8xf32>
    %281 = vector.shape_cast %280 : vector<2x8xf32> to vector<2x8x1xf32>
    %282 = tpu.reciprocal %281 {approx = true} : vector<2x8x1xf32> -> vector<2x8x1xf32>
    %283 = vector.broadcast %282 : vector<2x8x1xf32> to vector<2x8x8xf32>
    %284 = arith.mulf %279, %283 : vector<2x8x8xf32>
    "tpu.trace_start"() <{level = 10 : i32, message = "bqk,bkh->bqh"}> : () -> ()
    %cst_103 = arith.constant dense<0.000000e+00> : vector<2x8x8xf32>
    %285 = tpu.matmul %284, %271, %cst_103 {dimension_numbers = #tpu.dot_dimension_numbers<[2], [1], [1], [2], [0, 0, 0, 1, 1, 2], [0], [0]>} : vector<2x8x8xf32>, vector<2x8x8xf32>, vector<2x8x8xf32> -> vector<2x8x8xf32>
    "tpu.trace_stop"() : () -> ()
    %286 = vector.shape_cast %285 : vector<2x8x8xf32> to vector<16x8xf32>
    %287 = arith.truncf %286 : vector<16x8xf32> to vector<16x8xbf16>
    %288 = vector.extract_strided_slice %258 {offsets = [0, 0], sizes = [8, 32], strides = [1, 1]} : vector<32x32xbf16> to vector<8x32xbf16>
    %cst_104 = arith.constant dense<0.000000e+00> : vector<16x32xf32>
    %289 = tpu.matmul %287, %288, %cst_104 {dimension_numbers = #tpu.dot_dimension_numbers<[1], [0], [0], [1], [0, 0, 1, 1], [], []>} : vector<16x8xbf16>, vector<8x32xbf16>, vector<16x32xf32> -> vector<16x32xf32>
    %290 = arith.addf %268, %289 : vector<16x32xf32>
    %291 = vector.extract_strided_slice %267 {offsets = [0, 0, 8], sizes = [2, 8, 8], strides = [1, 1, 1]} : vector<2x8x96xf32> to vector<2x8x8xf32>
    %292 = vector.extract_strided_slice %267 {offsets = [0, 0, 40], sizes = [2, 8, 8], strides = [1, 1, 1]} : vector<2x8x96xf32> to vector<2x8x8xf32>
    %293 = vector.extract_strided_slice %267 {offsets = [0, 0, 72], sizes = [2, 8, 8], strides = [1, 1, 1]} : vector<2x8x96xf32> to vector<2x8x8xf32>
    "tpu.trace_start"() <{level = 10 : i32, message = "bqh,bkh->bqk"}> : () -> ()
    %cst_105 = arith.constant dense<0.000000e+00> : vector<2x8x8xf32>
    %294 = tpu.matmul %291, %292, %cst_105 {dimension_numbers = #tpu.dot_dimension_numbers<[2], [2], [1], [1], [0, 0, 0, 1, 1, 1], [0], [0]>} : vector<2x8x8xf32>, vector<2x8x8xf32>, vector<2x8x8xf32> -> vector<2x8x8xf32>
    "tpu.trace_stop"() : () -> ()
    %295 = vector.broadcast %44 : vector<2x1x8xf32> to vector<2x8x8xf32>
    %296 = arith.addf %294, %295 : vector<2x8x8xf32>
    %cst_106 = arith.constant dense<0xFF800000> : vector<2x8xf32>
    %297 = vector.multi_reduction <maximumf>, %296, %cst_106 [2] : vector<2x8x8xf32> to vector<2x8xf32>
    %298 = vector.shape_cast %297 : vector<2x8xf32> to vector<2x8x1xf32>
    %299 = vector.broadcast %298 : vector<2x8x1xf32> to vector<2x8x8xf32>
    %300 = arith.subf %296, %299 : vector<2x8x8xf32>
    %301 = math.exp %300 : vector<2x8x8xf32>
    %cst_107 = arith.constant dense<0.000000e+00> : vector<2x8xf32>
    %302 = vector.multi_reduction <add>, %301, %cst_107 [2] : vector<2x8x8xf32> to vector<2x8xf32>
    %303 = vector.shape_cast %302 : vector<2x8xf32> to vector<2x8x1xf32>
    %304 = tpu.reciprocal %303 {approx = true} : vector<2x8x1xf32> -> vector<2x8x1xf32>
    %305 = vector.broadcast %304 : vector<2x8x1xf32> to vector<2x8x8xf32>
    %306 = arith.mulf %301, %305 : vector<2x8x8xf32>
    "tpu.trace_start"() <{level = 10 : i32, message = "bqk,bkh->bqh"}> : () -> ()
    %cst_108 = arith.constant dense<0.000000e+00> : vector<2x8x8xf32>
    %307 = tpu.matmul %306, %293, %cst_108 {dimension_numbers = #tpu.dot_dimension_numbers<[2], [1], [1], [2], [0, 0, 0, 1, 1, 2], [0], [0]>} : vector<2x8x8xf32>, vector<2x8x8xf32>, vector<2x8x8xf32> -> vector<2x8x8xf32>
    "tpu.trace_stop"() : () -> ()
    %308 = vector.shape_cast %307 : vector<2x8x8xf32> to vector<16x8xf32>
    %309 = arith.truncf %308 : vector<16x8xf32> to vector<16x8xbf16>
    %310 = vector.extract_strided_slice %258 {offsets = [8, 0], sizes = [8, 32], strides = [1, 1]} : vector<32x32xbf16> to vector<8x32xbf16>
    %cst_109 = arith.constant dense<0.000000e+00> : vector<16x32xf32>
    %311 = tpu.matmul %309, %310, %cst_109 {dimension_numbers = #tpu.dot_dimension_numbers<[1], [0], [0], [1], [0, 0, 1, 1], [], []>} : vector<16x8xbf16>, vector<8x32xbf16>, vector<16x32xf32> -> vector<16x32xf32>
    %312 = arith.addf %290, %311 : vector<16x32xf32>
    %313 = vector.extract_strided_slice %267 {offsets = [0, 0, 16], sizes = [2, 8, 8], strides = [1, 1, 1]} : vector<2x8x96xf32> to vector<2x8x8xf32>
    %314 = vector.extract_strided_slice %267 {offsets = [0, 0, 48], sizes = [2, 8, 8], strides = [1, 1, 1]} : vector<2x8x96xf32> to vector<2x8x8xf32>
    %315 = vector.extract_strided_slice %267 {offsets = [0, 0, 80], sizes = [2, 8, 8], strides = [1, 1, 1]} : vector<2x8x96xf32> to vector<2x8x8xf32>
    "tpu.trace_start"() <{level = 10 : i32, message = "bqh,bkh->bqk"}> : () -> ()
    %cst_110 = arith.constant dense<0.000000e+00> : vector<2x8x8xf32>
    %316 = tpu.matmul %313, %314, %cst_110 {dimension_numbers = #tpu.dot_dimension_numbers<[2], [2], [1], [1], [0, 0, 0, 1, 1, 1], [0], [0]>} : vector<2x8x8xf32>, vector<2x8x8xf32>, vector<2x8x8xf32> -> vector<2x8x8xf32>
    "tpu.trace_stop"() : () -> ()
    %317 = vector.broadcast %44 : vector<2x1x8xf32> to vector<2x8x8xf32>
    %318 = arith.addf %316, %317 : vector<2x8x8xf32>
    %cst_111 = arith.constant dense<0xFF800000> : vector<2x8xf32>
    %319 = vector.multi_reduction <maximumf>, %318, %cst_111 [2] : vector<2x8x8xf32> to vector<2x8xf32>
    %320 = vector.shape_cast %319 : vector<2x8xf32> to vector<2x8x1xf32>
    %321 = vector.broadcast %320 : vector<2x8x1xf32> to vector<2x8x8xf32>
    %322 = arith.subf %318, %321 : vector<2x8x8xf32>
    %323 = math.exp %322 : vector<2x8x8xf32>
    %cst_112 = arith.constant dense<0.000000e+00> : vector<2x8xf32>
    %324 = vector.multi_reduction <add>, %323, %cst_112 [2] : vector<2x8x8xf32> to vector<2x8xf32>
    %325 = vector.shape_cast %324 : vector<2x8xf32> to vector<2x8x1xf32>
    %326 = tpu.reciprocal %325 {approx = true} : vector<2x8x1xf32> -> vector<2x8x1xf32>
    %327 = vector.broadcast %326 : vector<2x8x1xf32> to vector<2x8x8xf32>
    %328 = arith.mulf %323, %327 : vector<2x8x8xf32>
    "tpu.trace_start"() <{level = 10 : i32, message = "bqk,bkh->bqh"}> : () -> ()
    %cst_113 = arith.constant dense<0.000000e+00> : vector<2x8x8xf32>
    %329 = tpu.matmul %328, %315, %cst_113 {dimension_numbers = #tpu.dot_dimension_numbers<[2], [1], [1], [2], [0, 0, 0, 1, 1, 2], [0], [0]>} : vector<2x8x8xf32>, vector<2x8x8xf32>, vector<2x8x8xf32> -> vector<2x8x8xf32>
    "tpu.trace_stop"() : () -> ()
    %330 = vector.shape_cast %329 : vector<2x8x8xf32> to vector<16x8xf32>
    %331 = arith.truncf %330 : vector<16x8xf32> to vector<16x8xbf16>
    %332 = vector.extract_strided_slice %258 {offsets = [16, 0], sizes = [8, 32], strides = [1, 1]} : vector<32x32xbf16> to vector<8x32xbf16>
    %cst_114 = arith.constant dense<0.000000e+00> : vector<16x32xf32>
    %333 = tpu.matmul %331, %332, %cst_114 {dimension_numbers = #tpu.dot_dimension_numbers<[1], [0], [0], [1], [0, 0, 1, 1], [], []>} : vector<16x8xbf16>, vector<8x32xbf16>, vector<16x32xf32> -> vector<16x32xf32>
    %334 = arith.addf %312, %333 : vector<16x32xf32>
    %335 = vector.extract_strided_slice %267 {offsets = [0, 0, 24], sizes = [2, 8, 8], strides = [1, 1, 1]} : vector<2x8x96xf32> to vector<2x8x8xf32>
    %336 = vector.extract_strided_slice %267 {offsets = [0, 0, 56], sizes = [2, 8, 8], strides = [1, 1, 1]} : vector<2x8x96xf32> to vector<2x8x8xf32>
    %337 = vector.extract_strided_slice %267 {offsets = [0, 0, 88], sizes = [2, 8, 8], strides = [1, 1, 1]} : vector<2x8x96xf32> to vector<2x8x8xf32>
    "tpu.trace_start"() <{level = 10 : i32, message = "bqh,bkh->bqk"}> : () -> ()
    %cst_115 = arith.constant dense<0.000000e+00> : vector<2x8x8xf32>
    %338 = tpu.matmul %335, %336, %cst_115 {dimension_numbers = #tpu.dot_dimension_numbers<[2], [2], [1], [1], [0, 0, 0, 1, 1, 1], [0], [0]>} : vector<2x8x8xf32>, vector<2x8x8xf32>, vector<2x8x8xf32> -> vector<2x8x8xf32>
    "tpu.trace_stop"() : () -> ()
    %339 = vector.broadcast %44 : vector<2x1x8xf32> to vector<2x8x8xf32>
    %340 = arith.addf %338, %339 : vector<2x8x8xf32>
    %cst_116 = arith.constant dense<0xFF800000> : vector<2x8xf32>
    %341 = vector.multi_reduction <maximumf>, %340, %cst_116 [2] : vector<2x8x8xf32> to vector<2x8xf32>
    %342 = vector.shape_cast %341 : vector<2x8xf32> to vector<2x8x1xf32>
    %343 = vector.broadcast %342 : vector<2x8x1xf32> to vector<2x8x8xf32>
    %344 = arith.subf %340, %343 : vector<2x8x8xf32>
    %345 = math.exp %344 : vector<2x8x8xf32>
    %cst_117 = arith.constant dense<0.000000e+00> : vector<2x8xf32>
    %346 = vector.multi_reduction <add>, %345, %cst_117 [2] : vector<2x8x8xf32> to vector<2x8xf32>
    %347 = vector.shape_cast %346 : vector<2x8xf32> to vector<2x8x1xf32>
    %348 = tpu.reciprocal %347 {approx = true} : vector<2x8x1xf32> -> vector<2x8x1xf32>
    %349 = vector.broadcast %348 : vector<2x8x1xf32> to vector<2x8x8xf32>
    %350 = arith.mulf %345, %349 : vector<2x8x8xf32>
    "tpu.trace_start"() <{level = 10 : i32, message = "bqk,bkh->bqh"}> : () -> ()
    %cst_118 = arith.constant dense<0.000000e+00> : vector<2x8x8xf32>
    %351 = tpu.matmul %350, %337, %cst_118 {dimension_numbers = #tpu.dot_dimension_numbers<[2], [1], [1], [2], [0, 0, 0, 1, 1, 2], [0], [0]>} : vector<2x8x8xf32>, vector<2x8x8xf32>, vector<2x8x8xf32> -> vector<2x8x8xf32>
    "tpu.trace_stop"() : () -> ()
    %352 = vector.shape_cast %351 : vector<2x8x8xf32> to vector<16x8xf32>
    %353 = arith.truncf %352 : vector<16x8xf32> to vector<16x8xbf16>
    %354 = vector.extract_strided_slice %258 {offsets = [24, 0], sizes = [8, 32], strides = [1, 1]} : vector<32x32xbf16> to vector<8x32xbf16>
    %cst_119 = arith.constant dense<0.000000e+00> : vector<16x32xf32>
    %355 = tpu.matmul %353, %354, %cst_119 {dimension_numbers = #tpu.dot_dimension_numbers<[1], [0], [0], [1], [0, 0, 1, 1], [], []>} : vector<16x8xbf16>, vector<8x32xbf16>, vector<16x32xf32> -> vector<16x32xf32>
    %356 = arith.addf %334, %355 : vector<16x32xf32>
    %357 = arith.addf %254, %356 : vector<16x32xf32>
    %358 = vector.extract_strided_slice %256 {offsets = [0, 0], sizes = [1, 32], strides = [1, 1]} : vector<6x32xf32> to vector<1x32xf32>
    %359 = vector.broadcast %358 : vector<1x32xf32> to vector<16x32xf32>
    %360 = arith.addf %357, %359 : vector<16x32xf32>
    %361 = vector.extract_strided_slice %256 {offsets = [1, 0], sizes = [1, 32], strides = [1, 1]} : vector<6x32xf32> to vector<1x32xf32>
    %362 = vector.extract_strided_slice %256 {offsets = [2, 0], sizes = [1, 32], strides = [1, 1]} : vector<6x32xf32> to vector<1x32xf32>
    %cst_120 = arith.constant dense<0.000000e+00> : vector<16xf32>
    %363 = vector.multi_reduction <add>, %360, %cst_120 [1] : vector<16x32xf32> to vector<16xf32>
    %364 = vector.shape_cast %363 : vector<16xf32> to vector<16x1xf32>
    %cst_121 = arith.constant 3.200000e+01 : f32
    %365 = vector.broadcast %cst_121 : f32 to vector<16x1xf32>
    %366 = arith.divf %364, %365 : vector<16x1xf32>
    %367 = vector.broadcast %366 : vector<16x1xf32> to vector<16x32xf32>
    %368 = arith.subf %360, %367 : vector<16x32xf32>
    %369 = arith.mulf %368, %368 : vector<16x32xf32>
    %cst_122 = arith.constant dense<0.000000e+00> : vector<16xf32>
    %370 = vector.multi_reduction <add>, %369, %cst_122 [1] : vector<16x32xf32> to vector<16xf32>
    %371 = vector.shape_cast %370 : vector<16xf32> to vector<16x1xf32>
    %cst_123 = arith.constant 3.200000e+01 : f32
    %372 = vector.broadcast %cst_123 : f32 to vector<16x1xf32>
    %373 = arith.divf %371, %372 : vector<16x1xf32>
    %374 = vector.broadcast %366 : vector<16x1xf32> to vector<16x32xf32>
    %375 = arith.subf %360, %374 : vector<16x32xf32>
    %cst_124 = arith.constant 9.99999996E-13 : f32
    %376 = vector.broadcast %cst_124 : f32 to vector<16x1xf32>
    %377 = arith.addf %373, %376 : vector<16x1xf32>
    %378 = math.rsqrt %377 : vector<16x1xf32>
    %379 = vector.broadcast %378 : vector<16x1xf32> to vector<16x32xf32>
    %380 = arith.mulf %375, %379 : vector<16x32xf32>
    %381 = vector.broadcast %361 : vector<1x32xf32> to vector<16x32xf32>
    %382 = arith.mulf %380, %381 : vector<16x32xf32>
    %383 = vector.broadcast %362 : vector<1x32xf32> to vector<16x32xf32>
    %384 = arith.addf %382, %383 : vector<16x32xf32>
    %385 = arith.truncf %384 : vector<16x32xf32> to vector<16x32xbf16>
    %c1_125 = arith.constant 1 : index
    %c0_126 = arith.constant 0 : index
    %c0_127 = arith.constant 0 : index
    %386 = vector.load %arg10[%c1_125, %c0_126, %c0_127] : memref<2x32x64xbf16, #tpu.memory_space<vmem>>, vector<1x32x64xbf16>
    %387 = vector.shape_cast %386 : vector<1x32x64xbf16> to vector<32x64xbf16>
    %cst_128 = arith.constant dense<0.000000e+00> : vector<16x64xf32>
    %388 = tpu.matmul %385, %387, %cst_128 {dimension_numbers = #tpu.dot_dimension_numbers<[1], [0], [0], [1], [0, 0, 1, 1], [], []>} : vector<16x32xbf16>, vector<32x64xbf16>, vector<16x64xf32> -> vector<16x64xf32>
    %c1_129 = arith.constant 1 : index
    %c0_130 = arith.constant 0 : index
    %c0_131 = arith.constant 0 : index
    %389 = vector.load %arg11[%c1_129, %c0_130, %c0_131] : memref<2x1x64xf32, #tpu.memory_space<vmem>>, vector<1x1x64xf32>
    %390 = vector.shape_cast %389 : vector<1x1x64xf32> to vector<1x64xf32>
    %391 = vector.broadcast %390 : vector<1x64xf32> to vector<16x64xf32>
    %392 = arith.addf %388, %391 : vector<16x64xf32>
    %cst_132 = arith.constant 5.000000e-01 : f32
    %393 = vector.broadcast %cst_132 : f32 to vector<16x64xf32>
    %394 = arith.mulf %393, %392 : vector<16x64xf32>
    %cst_133 = arith.constant 0.707106769 : f32
    %395 = vector.broadcast %cst_133 : f32 to vector<16x64xf32>
    %396 = arith.mulf %392, %395 : vector<16x64xf32>
    %cst_134 = arith.constant 0.000000e+00 : f32
    %397 = vector.broadcast %cst_134 : f32 to vector<16x64xf32>
    %398 = arith.cmpf oge, %396, %397 : vector<16x64xf32>
    %cst_135 = arith.constant 1.000000e+00 : f32
    %cst_136 = arith.constant -1.000000e+00 : f32
    %399 = vector.broadcast %cst_135 : f32 to vector<16x64xf32>
    %400 = vector.broadcast %cst_136 : f32 to vector<16x64xf32>
    %401 = arith.select %398, %399, %400 : vector<16x64xi1>, vector<16x64xf32>
    %402 = math.absf %396 : vector<16x64xf32>
    %cst_137 = arith.constant 0.327591091 : f32
    %403 = vector.broadcast %cst_137 : f32 to vector<16x64xf32>
    %404 = arith.mulf %403, %402 : vector<16x64xf32>
    %cst_138 = arith.constant 1.000000e+00 : f32
    %405 = vector.broadcast %cst_138 : f32 to vector<16x64xf32>
    %406 = arith.addf %405, %404 : vector<16x64xf32>
    %407 = tpu.reciprocal %406 {approx = true} : vector<16x64xf32> -> vector<16x64xf32>
    %cst_139 = arith.constant 1.06140542 : f32
    %408 = vector.broadcast %cst_139 : f32 to vector<16x64xf32>
    %409 = arith.mulf %408, %407 : vector<16x64xf32>
    %cst_140 = arith.constant -1.45315206 : f32
    %410 = vector.broadcast %cst_140 : f32 to vector<16x64xf32>
    %411 = arith.addf %409, %410 : vector<16x64xf32>
    %412 = arith.mulf %411, %407 : vector<16x64xf32>
    %cst_141 = arith.constant 1.42141378 : f32
    %413 = vector.broadcast %cst_141 : f32 to vector<16x64xf32>
    %414 = arith.addf %412, %413 : vector<16x64xf32>
    %415 = arith.mulf %414, %407 : vector<16x64xf32>
    %cst_142 = arith.constant -0.284496725 : f32
    %416 = vector.broadcast %cst_142 : f32 to vector<16x64xf32>
    %417 = arith.addf %415, %416 : vector<16x64xf32>
    %418 = arith.mulf %417, %407 : vector<16x64xf32>
    %cst_143 = arith.constant 0.254829586 : f32
    %419 = vector.broadcast %cst_143 : f32 to vector<16x64xf32>
    %420 = arith.addf %418, %419 : vector<16x64xf32>
    %421 = arith.mulf %420, %407 : vector<16x64xf32>
    %cst_144 = arith.constant 0.000000e+00 : f32
    %422 = vector.broadcast %cst_144 : f32 to vector<16x64xf32>
    %423 = arith.subf %422, %402 : vector<16x64xf32>
    %424 = arith.mulf %423, %402 : vector<16x64xf32>
    %425 = math.exp %424 : vector<16x64xf32>
    %426 = arith.mulf %421, %425 : vector<16x64xf32>
    %cst_145 = arith.constant 1.000000e+00 : f32
    %427 = vector.broadcast %cst_145 : f32 to vector<16x64xf32>
    %428 = arith.subf %427, %426 : vector<16x64xf32>
    %429 = arith.mulf %401, %428 : vector<16x64xf32>
    %cst_146 = arith.constant 1.000000e+00 : f32
    %430 = vector.broadcast %cst_146 : f32 to vector<16x64xf32>
    %431 = arith.addf %430, %429 : vector<16x64xf32>
    %432 = arith.mulf %394, %431 : vector<16x64xf32>
    %433 = arith.truncf %432 : vector<16x64xf32> to vector<16x64xbf16>
    %c1_147 = arith.constant 1 : index
    %c0_148 = arith.constant 0 : index
    %c0_149 = arith.constant 0 : index
    %434 = vector.load %arg12[%c1_147, %c0_148, %c0_149] : memref<2x64x32xbf16, #tpu.memory_space<vmem>>, vector<1x64x32xbf16>
    %435 = vector.shape_cast %434 : vector<1x64x32xbf16> to vector<64x32xbf16>
    %cst_150 = arith.constant dense<0.000000e+00> : vector<16x32xf32>
    %436 = tpu.matmul %433, %435, %cst_150 {dimension_numbers = #tpu.dot_dimension_numbers<[1], [0], [0], [1], [0, 0, 1, 1], [], []>} : vector<16x64xbf16>, vector<64x32xbf16>, vector<16x32xf32> -> vector<16x32xf32>
    %437 = vector.extract_strided_slice %256 {offsets = [3, 0], sizes = [1, 32], strides = [1, 1]} : vector<6x32xf32> to vector<1x32xf32>
    %438 = vector.broadcast %437 : vector<1x32xf32> to vector<16x32xf32>
    %439 = arith.addf %436, %438 : vector<16x32xf32>
    %440 = arith.addf %384, %439 : vector<16x32xf32>
    %441 = vector.extract_strided_slice %256 {offsets = [4, 0], sizes = [1, 32], strides = [1, 1]} : vector<6x32xf32> to vector<1x32xf32>
    %442 = vector.extract_strided_slice %256 {offsets = [5, 0], sizes = [1, 32], strides = [1, 1]} : vector<6x32xf32> to vector<1x32xf32>
    %cst_151 = arith.constant dense<0.000000e+00> : vector<16xf32>
    %443 = vector.multi_reduction <add>, %440, %cst_151 [1] : vector<16x32xf32> to vector<16xf32>
    %444 = vector.shape_cast %443 : vector<16xf32> to vector<16x1xf32>
    %cst_152 = arith.constant 3.200000e+01 : f32
    %445 = vector.broadcast %cst_152 : f32 to vector<16x1xf32>
    %446 = arith.divf %444, %445 : vector<16x1xf32>
    %447 = vector.broadcast %446 : vector<16x1xf32> to vector<16x32xf32>
    %448 = arith.subf %440, %447 : vector<16x32xf32>
    %449 = arith.mulf %448, %448 : vector<16x32xf32>
    %cst_153 = arith.constant dense<0.000000e+00> : vector<16xf32>
    %450 = vector.multi_reduction <add>, %449, %cst_153 [1] : vector<16x32xf32> to vector<16xf32>
    %451 = vector.shape_cast %450 : vector<16xf32> to vector<16x1xf32>
    %cst_154 = arith.constant 3.200000e+01 : f32
    %452 = vector.broadcast %cst_154 : f32 to vector<16x1xf32>
    %453 = arith.divf %451, %452 : vector<16x1xf32>
    %454 = vector.broadcast %446 : vector<16x1xf32> to vector<16x32xf32>
    %455 = arith.subf %440, %454 : vector<16x32xf32>
    %cst_155 = arith.constant 9.99999996E-13 : f32
    %456 = vector.broadcast %cst_155 : f32 to vector<16x1xf32>
    %457 = arith.addf %453, %456 : vector<16x1xf32>
    %458 = math.rsqrt %457 : vector<16x1xf32>
    %459 = vector.broadcast %458 : vector<16x1xf32> to vector<16x32xf32>
    %460 = arith.mulf %455, %459 : vector<16x32xf32>
    %461 = vector.broadcast %441 : vector<1x32xf32> to vector<16x32xf32>
    %462 = arith.mulf %460, %461 : vector<16x32xf32>
    %463 = vector.broadcast %442 : vector<1x32xf32> to vector<16x32xf32>
    %464 = arith.addf %462, %463 : vector<16x32xf32>
    %465 = vector.extract_strided_slice %464 {offsets = [0, 0], sizes = [1, 32], strides = [1, 1]} : vector<16x32xf32> to vector<1x32xf32>
    %c0_156 = arith.constant 0 : index
    %c0_157 = arith.constant 0 : index
    %466 = vector.load %arg13[%c0_156, %c0_157] : memref<2x32xf32, #tpu.memory_space<vmem>>, vector<1x32xf32>
    tpu.vector_store %arg13[%c0_156, %c0_157], %465 {strides = array<i32>} : memref<2x32xf32, #tpu.memory_space<vmem>>, vector<1x32xf32>,
    %467 = vector.extract_strided_slice %464 {offsets = [8, 0], sizes = [1, 32], strides = [1, 1]} : vector<16x32xf32> to vector<1x32xf32>
    %c1_158 = arith.constant 1 : index
    %c0_159 = arith.constant 0 : index
    %468 = vector.load %arg13[%c1_158, %c0_159] : memref<2x32xf32, #tpu.memory_space<vmem>>, vector<1x32xf32>
    tpu.vector_store %arg13[%c1_158, %c0_159], %467 {strides = array<i32>} : memref<2x32xf32, #tpu.memory_space<vmem>>, vector<1x32xf32>,
    return
  }
  func.func @transform_0(%arg0: i32) -> (i32, i32) {
    %c0_i32 = arith.constant 0 : i32
    %c0_i32_0 = arith.constant 0 : i32
    %c0_i32_1 = arith.constant 0 : i32
    return %c0_i32, %c0_i32_0 : i32, i32
  }
  func.func @transform_1(%arg0: i32) -> (i32, i32, i32) {
    %c0_i32 = arith.constant 0 : i32
    %c0_i32_0 = arith.constant 0 : i32
    %c0_i32_1 = arith.constant 0 : i32
    %c0_i32_2 = arith.constant 0 : i32
    return %c0_i32, %c0_i32_0, %c0_i32_1 : i32, i32, i32
  }
  func.func @transform_2(%arg0: i32) -> (i32, i32) {
    %c0_i32 = arith.constant 0 : i32
    %c0_i32_0 = arith.constant 0 : i32
    %c0_i32_1 = arith.constant 0 : i32
    return %c0_i32, %c0_i32_0 : i32, i32
  }
  func.func @transform_3(%arg0: i32) -> (i32, i32) {
    %c0_i32 = arith.constant 0 : i32
    %c0_i32_0 = arith.constant 0 : i32
    %c0_i32_1 = arith.constant 0 : i32
    return %c0_i32, %c0_i32_0 : i32, i32
  }
  func.func @transform_4(%arg0: i32) -> (i32, i32) {
    %c0_i32 = arith.constant 0 : i32
    %c0_i32_0 = arith.constant 0 : i32
    %c0_i32_1 = arith.constant 0 : i32
    return %c0_i32, %c0_i32_0 : i32, i32
  }
  func.func @transform_5(%arg0: i32) -> (i32, i32, i32) {
    %c0_i32 = arith.constant 0 : i32
    %c0_i32_0 = arith.constant 0 : i32
    %c0_i32_1 = arith.constant 0 : i32
    %c0_i32_2 = arith.constant 0 : i32
    return %c0_i32, %c0_i32_0, %c0_i32_1 : i32, i32, i32
  }
  func.func @transform_6(%arg0: i32) -> (i32, i32, i32) {
    %c0_i32 = arith.constant 0 : i32
    %c0_i32_0 = arith.constant 0 : i32
    %c0_i32_1 = arith.constant 0 : i32
    %c0_i32_2 = arith.constant 0 : i32
    return %c0_i32, %c0_i32_0, %c0_i32_1 : i32, i32, i32
  }
  func.func @transform_7(%arg0: i32) -> (i32, i32, i32) {
    %c0_i32 = arith.constant 0 : i32
    %c0_i32_0 = arith.constant 0 : i32
    %c0_i32_1 = arith.constant 0 : i32
    %c0_i32_2 = arith.constant 0 : i32
    return %c0_i32, %c0_i32_0, %c0_i32_1 : i32, i32, i32
  }
  func.func @transform_8(%arg0: i32) -> (i32, i32, i32) {
    %c0_i32 = arith.constant 0 : i32
    %c0_i32_0 = arith.constant 0 : i32
    %c0_i32_1 = arith.constant 0 : i32
    %c0_i32_2 = arith.constant 0 : i32
    return %c0_i32, %c0_i32_0, %c0_i32_1 : i32, i32, i32
  }
  func.func @transform_9(%arg0: i32) -> (i32, i32, i32) {
    %c0_i32 = arith.constant 0 : i32
    %c0_i32_0 = arith.constant 0 : i32
    %c0_i32_1 = arith.constant 0 : i32
    %c0_i32_2 = arith.constant 0 : i32
    return %c0_i32, %c0_i32_0, %c0_i32_1 : i32, i32, i32
  }
  func.func @transform_10(%arg0: i32) -> (i32, i32, i32) {
    %c0_i32 = arith.constant 0 : i32
    %c0_i32_0 = arith.constant 0 : i32
    %c0_i32_1 = arith.constant 0 : i32
    %c0_i32_2 = arith.constant 0 : i32
    return %c0_i32, %c0_i32_0, %c0_i32_1 : i32, i32, i32
  }
  func.func @transform_11(%arg0: i32) -> (i32, i32, i32) {
    %c0_i32 = arith.constant 0 : i32
    %c0_i32_0 = arith.constant 0 : i32
    %c0_i32_1 = arith.constant 0 : i32
    %c0_i32_2 = arith.constant 0 : i32
    return %c0_i32, %c0_i32_0, %c0_i32_1 : i32, i32, i32
  }
  func.func @transform_12(%arg0: i32) -> (i32, i32) {
    %c0_i32 = arith.constant 0 : i32
    %c0_i32_0 = arith.constant 0 : i32
    %c0_i32_1 = arith.constant 0 : i32
    return %c0_i32, %c0_i32_0 : i32, i32
  }
}

</mosaic_0001>

<bundles_post_ra>
// kernel: tpu_custom_call.1
= control target key start
LH: loop header
LB: loop body
LE: loop exit
PB: predicated region body
PF: predicated region fallthrough
CT: control target
= control target key end

     0   :  { %v4697_v2 = vmov 0   ;;  %v4698_v11 = vmov 0.0   ;;  %s5431_s0 = inlined_call_operand.vmem [shape: s32[16,1], index: 0, kind: input, shape index: {}]   ;;  %s5432_s1 = inlined_call_operand.vmem [shape: s32[2,1,8], index: 1, kind: input, shape index: {}]   ;;  %s5433_s2 = inlined_call_operand.vmem [shape: f32[100,32], index: 2, kind: input, shape index: {}]   ;;  %s5434_s3 = inlined_call_operand.vmem [shape: f32[16,32], index: 3, kind: input, shape index: {}]   ;;  %s5435_s4 = inlined_call_operand.vmem [shape: f32[2,32], index: 4, kind: input, shape index: {}]   ;;  %s5436_s5 = inlined_call_operand.vmem [shape: bf16[2,32,96], index: 5, kind: input, shape index: {}]   ;;  %s5437_s6 = inlined_call_operand.vmem [shape: f32[2,1,96], index: 6, kind: input, shape index: {}]   ;;  %s5438_s7 = inlined_call_operand.vmem [shape: bf16[2,32,32], index: 7, kind: input, shape index: {}]   ;;  %s5439_s8 = inlined_call_operand.vmem [shape: f32[2,6,32], index: 8, kind: input, shape index: {}]   ;;  %s5440_s9 = inlined_call_operand.vmem [shape: bf16[2,32,64], index: 9, kind: input, shape index: {}]   ;;  %s5441_s10 = inlined_call_operand.vmem [shape: f32[2,1,64], index: 10, kind: input, shape index: {}]   ;;  %s5442_s11 = inlined_call_operand.vmem [shape: bf16[2,64,32], index: 11, kind: input, shape index: {}]   ;;  %s5443_s12 = inlined_call_operand.hbm [shape: f32[2,32], index: 12, kind: output, shape index: {}]  }
   0x1   :  { %v43_v0 = vld [vmem:[%s5431_s0] sm:$0xff]  ;;  %4556 = vset.pattern.permute.xlu0 %v4697_v2  ;;  %v60_v3 = vld [vmem:[%s5433_s2 + $0x8] sm:$0xff]  ;;  %v61_v4 = vld [vmem:[%s5433_s2 + $0x10] sm:$0xff]  ;;  %4252 = vmatprep.subr.bf16.mxu1 %v4698_v11 }
   0x2   :  { %v59_v1 = vld [vmem:[%s5433_s2] sm:$0xff]  ;;  %v62_v5 = vld [vmem:[%s5433_s2 + $0x18] sm:$0xff]  ;;  %48 = vperm.xlu0 %4556, %v43_v0   ;;  %v44_v8 = vld [vmem:[%s5431_s0 + $0x8] sm:$0xff] }
   0x3   :  { %v4516_v6 = vpack.c.bf16 %v60_v3, %v59_v1  ;;  %v4520_v7 = vpack.c.bf16 %v62_v5, %v61_v4  ;;  %v63_v9 = vld [vmem:[%s5433_s2 + $0x20] sm:$0xff]  ;;  %v64_v10 = vld [vmem:[%s5433_s2 + $0x28] sm:$0xff]  ;;  %v65_v12 = vld [vmem:[%s5433_s2 + $0x30] sm:$0xff] }
   0x4   :  { %v4524_v13 = vpack.c.bf16 %v64_v10, %v63_v9  ;;  %v66_v14 = vld [vmem:[%s5433_s2 + $0x38] sm:$0xff]  ;;  %v67_v15 = vld [vmem:[%s5433_s2 + $0x40] sm:$0xff]  ;;  %v68_v16 = vld [vmem:[%s5433_s2 + $0x48] sm:$0xff] }
   0x5   :  { %4517 = vmatprep.subr.bf16.mxu0 %v4516_v6  ;;  %v4528_v17 = vpack.c.bf16 %v66_v14, %v65_v12  ;;  %v69_v18 = vld [vmem:[%s5433_s2 + $0x50] sm:$0xff]  ;;  %v70_v19 = vld [vmem:[%s5433_s2 + $0x58] sm:$0xff]  ;;  %v4532_v20 = vpack.c.bf16 %v68_v16, %v67_v15 }
   0x6   :  { %4519 = vmatpush3.bf16.msra.mxu0 %v4516_v6  ;;  %51 = vperm.xlu0 %4556, %v44_v8  }
   0x7   :  { %4521 = vmatprep.subr.bf16.mxu0 %v4520_v7 }
   0xa   :  { %4523 = vmatpush3.bf16.msra.mxu0 %v4520_v7 }
   0xb   :  { %4525 = vmatprep.subr.bf16.mxu0 %v4524_v13 }
   0xe   :  { %4527 = vmatpush3.bf16.msra.mxu0 %v4524_v13 }
   0xf   :  { %4529 = vmatprep.subr.bf16.mxu0 %v4528_v17 }
  0x10   :  { %17 = vsyncpa [#allocation3], 0  ;;  %v4536_v21 = vpack.c.bf16 %v70_v19, %v69_v18  ;;  %v71_v22 = vld [vmem:[%s5433_s2 + $0x60] sm:$0xf]  ;;  %vm79_vm0 = vcmask 1043456   ;;  %v45_v23 = vlaneseq  ;;  %vm72_vm1 = vcmask 818176  }
  0x11   :  { %v158_v29 = vld [vmem:[%s5434_s3] sm:$0xff]  ;;  %vm162_vm4 = vcmask 261120   ;;  %v4558_v47 = vld [vmem:[%s5436_s5 + $0x8] sm:$0xff]   ;;  %vm4699_vm5 = vmmov 0   ;;  %s4700_s0 = smov 64   ;;  %s4701_s21 = smov 96  }
  0x12   :  { %4531 = vmatpush3.bf16.msra.mxu0 %v4528_v17  ;;  %v46_v24 = vand.u32 127, %v45_v23  ;;  %v4557_v46 = vld [vmem:[%s5436_s5] sm:$0xff]   ;;  %4256 = vmatprep.mubr.msk.bf16.mxu1 %vm4699_vm5, %v4698_v11  ;;  %v4848_v54 = vshrl.u32 %v45_v23, 7  ;;  %s4702_s22 = smov 88   ;;  %vm298_vm6 = vcmask 64512   ;;  %s4704_s27 = smov 56  }
  0x13   :  { %4533 = vmatprep.subr.bf16.mxu0 %v4532_v20  ;;  %4253 = vmatpush3.bf16.msra.mxu1 %v4557_v46  ;;  %v161_v56 = vld [vmem:[%s5435_s4] sm:$0x3]  ;;  %s4705_s28 = smov 112   ;;  %s4706_s29 = smov 80   ;;  %vm2013_vm9 = vcmask 523264   ;;  %vm3979_vm12 = vcmask 253952  }
  0x14   :  { %4254 = vmatprep.subr.bf16.mxu1 %v4698_v11  ;;  %v4851_v55 = vsub.s32 0, %v4848_v54  ;;  %v4858_v60 = vsub.s32 1, %v4848_v54  ;;  %v4001_v5 = vld [vmem:[%s5437_s6] ss:$0 sm:$0xff]  ;;  %v203_v19 = vld [vmem:[%s5432_s1 + $0x1] sm:$0x1] }
  0x15   :  { %v202_v17 = vld [vmem:[%s5432_s1] sm:$0x1]  ;;  %s4703_s1 = smov 120   ;;  %s4707_s3 = smov 72  }
  0x16   :  { %4535 = vmatpush3.bf16.msra.mxu0 %v4532_v20  ;;  %v193_v59 = vrot.slane %v161_v56, %v4851_v55  ;;  %v199_v0 = vrot.slane %v161_v56, %v4858_v60  ;;  %v204_v18 = vcvt.s32.f32 %v202_v17  ;;  %s4708_s15 = smov 104   ;;  %s4709_s16 = smov 48  }
  0x17   :  { %4537 = vmatprep.subr.bf16.mxu0 %v4536_v21  ;;  %4255 = vmatpush3.bf16.msra.mxu1 %v4558_v47  ;;  %s4710_s17 = smov 40  }
  0x18   :  { %4265 = vmatprep.subr.mxu1 %v4698_v11  ;;  %v206_v20 = vsub.f32 1.0, %v204_v18 }
  0x1a   :  { %4539 = vmatpush3.bf16.msra.mxu0 %v4536_v21  ;;  %v205_v21 = vcvt.s32.f32 %v203_v19 }
  0x1b   :  { %4247 = vmatprep.subr.msk.mxu0 %vm79_vm0, %v71_v22 }
  0x1c   :  { %v207_v23 = vsub.f32 1.0, %v205_v21 }
  0x1e   :  { %4248 = vmatpush3.msk.msra.mxu0 %vm79_vm0, %v71_v22  ;;  %v208_v22 = vmul.f32 -1e+09, %v206_v20 }
  0x1f   :  { %4260 = vmatprep.subr.mxu0 %v4698_v11 }
  0x81   :  { %v49_v25 = vpop.permute.xlu0 %48 }
  0x82   :  { %vm53_vm2 = vcmp.eq.s32.totalorder %v46_v24, %v49_v25  ;;  %v209_v25 = vmul.f32 -1e+09, %v207_v23 }
  0x83   :  { %v3996_v26 = vsel %vm53_vm2, 1.0, %v4698_v11 }
  0x84   :  { %4249 = vmatprep.mubr.msk.f32.mxu0 %vm72_vm1, %v3996_v26 }
  0x85   :  { %v52_v27 = vpop.permute.xlu0 %51 }
  0x86   :  { %vm54_vm3 = vcmp.eq.s32.totalorder %v46_v24, %v52_v27  ;;  %v4907_v24 = vrot.slane %v208_v22, %v4851_v55 }
  0x87   :  { %v3997_v28 = vsel %vm54_vm3, 1.0, %v4698_v11 }
  0x88   :  { %4250 = vmatmul.mubr.msk.f32.vlgmr.msra.gmra.mrb[0].mxu0 %vm72_vm1, %v3997_v28 }
  0x89   :  { %4262 = vmatprep.mubr.msk.f32.mxu0 %vm4699_vm5, %v4698_v11 }
 0x15b   :  { %v4251_v30 = vpop.f32.mrb[0].mxu0 }
 0x15c   :  { %v149_v31 = vpop.f32.mrb[1].mxu0  ;;  %v160_v33 = vadd.f32 %v4251_v30, %v158_v29 }
 0x15d   :  { %v159_v32 = vadd.f32 %v158_v29, %v149_v31  ;;  %v4911_v29 = vrot.slane %v209_v25, %v4851_v55 }
 0x15e   :  { %v166_v35 = vsel %vm162_vm4, %v160_v33, 0.0 }
 0x15f   :  { %v163_v34 = vsel %vm162_vm4, %v159_v32, 0.0 }
 0x160   :  { %164 = vadd.xlane.f32.xlu1 %v163_v34 }
 0x164   :  { %167 = vadd.xlane.f32.xlu1 %v166_v35 }
 0x1ed   :  { %v165_v36 = vpop.xlane.xlu1 %164 }
 0x1ee   :  { %v170_v37 = vmul.f32 0.03125, %v165_v36 }
 0x1f0   :  { %v172_v38 = vsub.f32 %v159_v32, %v170_v37 }
 0x1f1   :  { %v168_v39 = vpop.xlane.xlu1 %167 }
 0x1f2   :  { %v171_v40 = vmul.f32 0.03125, %v168_v39  ;;  %v174_v41 = vmul.f32 %v172_v38, %v172_v38 }
 0x1f4   :  { %v173_v42 = vsub.f32 %v160_v33, %v171_v40  ;;  %v176_v43 = vsel %vm162_vm4, %v174_v41, 0.0 }
 0x1f5   :  { %177 = vadd.xlane.f32.xlu0 %v176_v43 }
 0x1f6   :  { %v175_v44 = vmul.f32 %v173_v42, %v173_v42 }
 0x1f8   :  { %v179_v45 = vsel %vm162_vm4, %v175_v44, 0.0 }
 0x1f9   :  { %180 = vadd.xlane.f32.xlu1 %v179_v45 }
 0x282   :  { %v178_v48 = vpop.xlane.xlu0 %177 }
 0x283   :  { %v182_v49 = vmul.f32 0.03125, %v178_v48 }
 0x285   :  { %v184_v50 = vadd.f32 1e-12, %v182_v49 }
 0x286   :  { %v181_v51 = vpop.xlane.xlu1 %180 }
 0x287   :  { %4573 = vrsqrt.f32 %v184_v50  ;;  %v183_v52 = vmul.f32 0.03125, %v181_v51 }
 0x289   :  { %v185_v53 = vadd.f32 1e-12, %v183_v52 }
 0x28b   :  { %4575 = vrsqrt.f32 %v185_v53 }
 0x291   :  { %v4574_v57 = vpop.eup %4573 }
 0x292   :  { %v188_v58 = vmul.f32 %v4574_v57, %v172_v38 }
 0x294   :  { %v194_v63 = vmul.f32 %v193_v59, %v188_v58 }
 0x295   :  { %v4576_v61 = vpop.eup %4575 }
 0x296   :  { %v189_v62 = vmul.f32 %v4576_v61, %v173_v42  ;;  %v4861_v2 = vadd.f32 %v199_v0, %v194_v63 }
 0x298   :  { %v195_v1 = vmul.f32 %v193_v59, %v189_v62 }
 0x29a   :  { %v4863_v3 = vadd.f32 %v199_v0, %v195_v1 }
 0x29c   :  { %v215_v4 = vpack.c.bf16 %v4863_v3, %v4861_v2 }
 0x29e   :  { %4257 = vmatmul.mubr.msk.bf16.vlgmr.msra.gmra.mrb[0].mxu1 %vm162_vm4, %v215_v4 }
 0x29f   :  { %4267 = vmatprep.mubr.msk.f32.mxu1 %vm4699_vm5, %v4698_v11 }
 0x371   :  { %v276_v6 = vpop.f32.mrb[0].mxu1 }
 0x372   :  { %v4873_v7 = vadd.f32 %v4001_v5, %v276_v6  ;;  %v4258_v8 = vpop.f32.mrb[1].mxu1 }
 0x373   :  { %v279_v9 = vpop.f32.mrb[2].mxu1 }
 0x374   :  { %472 = vrot.lane.b32.xlu0 %v4873_v7, %s4700_s0  ;;  %296 = vrot.lane.b32.xlu1 %v4873_v7, %s4701_s21  ;;  %v4259_v10 = vpop.f32.mrb[3].mxu1  ;;  %v4879_v12 = vadd.f32 %v4001_v5, %v279_v9 }
 0x378   :  { %627 = vrot.lane.b32.xlu0 %v4873_v7, %s4702_s22  ;;  %374 = vrot.lane.b32.xlu1 %v4879_v12, %s4701_s21 }
 0x3e6   :  { %v473_v13 = vpop.permute.xlu0 %472  ;;  %v297_v14 = vpop.permute.xlu1 %296 }
 0x3e7   :  { %4261 = vmatpush3.xpose.msk.msra.mxu0 %vm298_vm6, %v297_v14 }
 0x3e8   :  { %4280 = vmatprep.subr.mxu0 %v4698_v11 }
 0x3ea   :  { %v628_v15 = vpop.permute.xlu0 %627  ;;  %4263 = vmatmul.mubr.msk.f32.vlgmr.msra.gmra.mrb[2].mxu0 %vm298_vm6, %v4873_v7  ;;  %v375_v16 = vpop.permute.xlu1 %374 }
 0x3eb   :  { %4266 = vmatpush3.xpose.msk.msra.mxu1 %vm298_vm6, %v375_v16  ;;  %4281 = vmatpush3.xpose.msk.msra.mxu0 %vm298_vm6, %v628_v15 }
 0x3ec   :  { %4270 = vmatprep.subr.mxu1 %v4698_v11  ;;  %4282 = vmatprep.mubr.msk.f32.mxu0 %vm4699_vm5, %v4698_v11 }
 0x3ed   :  { %4290 = vmatprep.subr.mxu0 %v4698_v11 }
 0x3ee   :  { %4268 = vmatmul.mubr.msk.f32.vlgmr.msra.gmra.mrb[4].mxu1 %vm298_vm6, %v4879_v12 }
 0x3ef   :  { %4271 = vmatpush3.msra.mxu1 %v473_v13  ;;  %4272 = vmatprep.mubr.msk.f32.mxu1 %vm4699_vm5, %v4698_v11 }
 0x3f0   :  { %4275 = vmatprep.subr.mxu1 %v4698_v11 }
 0x4bd   :  { %v369_v26 = vpop.f32.mrb[2].mxu0 }
 0x4be   :  { %v370_v27 = vadd.f32 %v369_v26, %v4907_v24  ;;  %v4264_v28 = vpop.f32.mrb[3].mxu0 }
 0x4c0   :  { %v450_v30 = vsel %vm298_vm6, %v370_v27, -inf }
 0x4c1   :  { %451 = vmax.xlane.f32.xlu1 %v450_v30  ;;  %v446_v31 = vpop.f32.mrb[4].mxu1  ;;  %v211_v30 = vld [vmem:[%s5438_s7] sm:$0xf] }
 0x4c2   :  { %v447_v32 = vadd.f32 %v446_v31, %v4911_v29  ;;  %v4269_v33 = vpop.f32.mrb[5].mxu1 }
 0x4c3   :  { %v1007_v33 = vsel %vm79_vm0, %v211_v30, 0 }
 0x4c4   :  { %v453_v34 = vsel %vm298_vm6, %v447_v32, -inf }
 0x4c5   :  { %454 = vmax.xlane.f32.xlu0 %v453_v34 }
 0x4d2   :  { %548 = vrot.lane.b32.xlu1 %v4879_v12, %s4700_s0 }
 0x4db   :  { %705 = vrot.lane.b32.xlu0 %v4879_v12, %s4702_s22 }
 0x54e   :  { %v452_v35 = vpop.xlane.xlu1 %451 }
 0x54f   :  { %v456_v36 = vsub.f32 %v370_v27, %v452_v35 }
 0x551   :  { %v458_v37 = vmul.f32 1.442695, %v456_v36  ;;  %v212_v36 = vld [vmem:[%s5438_s7 + $0x4] sm:$0xf] }
 0x552   :  { %v455_v40 = vpop.xlane.xlu0 %454  ;;  %v549_v50 = vpop.permute.xlu1 %548 }
 0x553   :  { %4577 = vpow2.f32 %v458_v37  ;;  %v457_v41 = vsub.f32 %v447_v32, %v455_v40  ;;  %v960_v37 = vsel %vm79_vm0, %v212_v36, 0 }
 0x555   :  { %v460_v42 = vmul.f32 1.442695, %v457_v41 }
 0x556   :  { %v706_v45 = vpop.permute.xlu0 %705 }
 0x557   :  { %4579 = vpow2.f32 %v460_v42 }
 0x55d   :  { %v4578_v38 = vpop.eup %4577 }
 0x55e   :  { %v462_v39 = vsel %vm298_vm6, %v4578_v38, 0.0 }
 0x55f   :  { %463 = vadd.xlane.f32.xlu0 %v462_v39 }
 0x561   :  { %v4580_v43 = vpop.eup %4579 }
 0x562   :  { %v465_v44 = vsel %vm298_vm6, %v4580_v43, 0.0 }
 0x575   :  { %625 = vrot.lane.b32.xlu0 %v4873_v7, %s4703_s1 }
 0x594   :  { %466 = vadd.xlane.f32.xlu0 %v465_v44 }
 0x5aa   :  { %703 = vrot.lane.b32.xlu0 %v4879_v12, %s4703_s1 }
 0x5ec   :  { %v464_v46 = vpop.xlane.xlu0 %463 }
 0x5ed   :  { %4581 = vrcp.f32 %v464_v46 }
 0x5f0   :  { %v626_v47 = vpop.permute.xlu0 %625 }
 0x5f1   :  { %4283 = vmatmul.mubr.msk.f32.vlgmr.msra.gmra.mrb[4].mxu0 %vm298_vm6, %v626_v47 }
 0x5f2   :  { %4292 = vmatprep.mubr.msk.f32.mxu0 %vm4699_vm5, %v4698_v11 }
 0x5f7   :  { %v4582_v48 = vpop.eup %4581 }
 0x5f8   :  { %v470_v49 = vmul.f32 %v4582_v48, %v4578_v38 }
 0x5fa   :  { %4273 = vmatmul.mubr.msk.f32.vlgmr.msra.gmra.mrb[6].mxu1 %vm298_vm6, %v470_v49 }
 0x5fb   :  { %4276 = vmatpush3.msra.mxu1 %v549_v50  ;;  %4277 = vmatprep.mubr.msk.f32.mxu1 %vm4699_vm5, %v4698_v11 }
 0x5fc   :  { %4285 = vmatprep.subr.mxu1 %v4698_v11 }
 0x621   :  { %v467_v51 = vpop.xlane.xlu0 %466 }
 0x622   :  { %4583 = vrcp.f32 %v467_v51 }
 0x625   :  { %v704_v56 = vpop.permute.xlu0 %703 }
 0x62c   :  { %v4584_v52 = vpop.eup %4583 }
 0x62d   :  { %v471_v53 = vmul.f32 %v4584_v52, %v4580_v43 }
 0x62f   :  { %4278 = vmatmul.mubr.msk.f32.vlgmr.msra.gmra.mrb[8].mxu1 %vm298_vm6, %v471_v53 }
 0x630   :  { %4286 = vmatpush3.xpose.msk.msra.mxu1 %vm298_vm6, %v706_v45  ;;  %4287 = vmatprep.mubr.msk.f32.mxu1 %vm4699_vm5, %v4698_v11 }
 0x631   :  { %4295 = vmatprep.subr.mxu1 %v4698_v11 }
 0x633   :  { %4288 = vmatmul.mubr.msk.f32.vlgmr.msra.gmra.mrb[10].mxu1 %vm298_vm6, %v704_v56 }
 0x634   :  { %4297 = vmatprep.mubr.msk.f32.mxu1 %vm4699_vm5, %v4698_v11 }
 0x6c4   :  { %v699_v57 = vpop.f32.mrb[4].mxu0 }
 0x6c5   :  { %v700_v58 = vadd.f32 %v699_v57, %v4907_v24  ;;  %v4284_v59 = vpop.f32.mrb[5].mxu0 }
 0x6c7   :  { %v781_v61 = vsel %vm298_vm6, %v700_v58, -inf }
 0x6c8   :  { %782 = vmax.xlane.f32.xlu1 %v781_v61 }
 0x6cd   :  { %v544_v62 = vpop.f32.mrb[6].mxu1 }
 0x6ce   :  { %v4274_v63 = vpop.f32.mrb[7].mxu1 }
 0x702   :  { %v620_v0 = vpop.f32.mrb[8].mxu1 }
 0x703   :  { %v624_v1 = vpack.c.bf16 %v620_v0, %v544_v62  ;;  %v4279_v4 = vpop.f32.mrb[9].mxu1 }
 0x706   :  { %v777_v5 = vpop.f32.mrb[10].mxu1 }
 0x707   :  { %v778_v6 = vadd.f32 %v777_v5, %v4911_v29  ;;  %v4289_v8 = vpop.f32.mrb[11].mxu1 }
 0x709   :  { %v784_v9 = vsel %vm298_vm6, %v778_v6, -inf }
 0x70a   :  { %785 = vmax.xlane.f32.xlu0 %v784_v9 }
 0x755   :  { %v783_v10 = vpop.xlane.xlu1 %782 }
 0x756   :  { %v787_v13 = vsub.f32 %v700_v58, %v783_v10 }
 0x758   :  { %v789_v14 = vmul.f32 1.442695, %v787_v13 }
 0x75a   :  { %4585 = vpow2.f32 %v789_v14 }
 0x764   :  { %v4586_v15 = vpop.eup %4585 }
 0x765   :  { %v793_v16 = vsel %vm298_vm6, %v4586_v15, 0.0 }
 0x766   :  { %794 = vadd.xlane.f32.xlu0 %v793_v16 }
 0x77c   :  { %803 = vrot.lane.b32.xlu0 %v4873_v7, %s4704_s27 }
 0x780   :  { %1128 = vrot.lane.b32.xlu0 %v4879_v12, %s4705_s28 }
 0x784   :  { %1050 = vrot.lane.b32.xlu0 %v4873_v7, %s4705_s28 }
 0x797   :  { %v786_v17 = vpop.xlane.xlu0 %785 }
 0x798   :  { %v788_v18 = vsub.f32 %v778_v6, %v786_v17 }
 0x79a   :  { %v791_v19 = vmul.f32 1.442695, %v788_v18 }
 0x79c   :  { %4587 = vpow2.f32 %v791_v19 }
 0x7a6   :  { %v4588_v20 = vpop.eup %4587 }
 0x7a7   :  { %v796_v21 = vsel %vm298_vm6, %v4588_v20, 0.0 }
 0x7a8   :  { %797 = vadd.xlane.f32.xlu1 %v796_v21 }
 0x7b9   :  { %879 = vrot.lane.b32.xlu1 %v4879_v12, %s4704_s27 }
 0x7bd   :  { %1130 = vrot.lane.b32.xlu1 %v4879_v12, %s4706_s29 }
 0x7c1   :  { %1052 = vrot.lane.b32.xlu1 %v4873_v7, %s4706_s29 }
 0x7f3   :  { %v795_v22 = vpop.xlane.xlu0 %794 }
 0x7f4   :  { %4589 = vrcp.f32 %v795_v22 }
 0x7f7   :  { %v804_v23 = vpop.permute.xlu0 %803 }
 0x7f8   :  { %4291 = vmatpush3.msra.mxu0 %v804_v23 }
 0x7f9   :  { %4300 = vmatprep.subr.bf16.mxu0 %v4698_v11 }
 0x7fb   :  { %v1129_v35 = vpop.permute.xlu0 %1128 }
 0x7fe   :  { %v4590_v25 = vpop.eup %4589 }
 0x7ff   :  { %v801_v26 = vmul.f32 %v4590_v25, %v4586_v15  ;;  %v1051_v48 = vpop.permute.xlu0 %1050 }
 0x801   :  { %4293 = vmatmul.mubr.msk.f32.vlgmr.msra.gmra.mrb[6].mxu0 %vm298_vm6, %v801_v26 }
 0x802   :  { %4302 = vmatprep.mubr.msk.bf16.mxu0 %vm4699_vm5, %v4698_v11  ;;  %4301 = vmatpush3.bf16.msra.mxu0 %v960_v37 }
 0x803   :  { %4312 = vmatprep.subr.mxu0 %v4698_v11 }
 0x835   :  { %v798_v27 = vpop.xlane.xlu1 %797 }
 0x836   :  { %4591 = vrcp.f32 %v798_v27 }
 0x839   :  { %v880_v28 = vpop.permute.xlu1 %879 }
 0x83a   :  { %4296 = vmatpush3.msra.mxu1 %v880_v28 }
 0x83b   :  { %4306 = vmatprep.subr.bf16.mxu1 %v4698_v11 }
 0x83d   :  { %v1131_v34 = vpop.permute.xlu1 %1130 }
 0x840   :  { %v4592_v31 = vpop.eup %4591 }
 0x841   :  { %v802_v32 = vmul.f32 %v4592_v31, %v4588_v20  ;;  %v1053_v43 = vpop.permute.xlu1 %1052 }
 0x843   :  { %4298 = vmatmul.mubr.msk.f32.vlgmr.msra.gmra.mrb[12].mxu1 %vm298_vm6, %v802_v32 }
 0x844   :  { %4307 = vmatpush3.bf16.msra.mxu1 %v1007_v33  ;;  %4308 = vmatprep.mubr.msk.bf16.mxu1 %vm4699_vm5, %v4698_v11 }
 0x845   :  { %4317 = vmatprep.subr.mxu1 %v4698_v11 }
 0x847   :  { %4309 = vmatmul.mubr.msk.bf16.vlgmr.msra.gmra.mrb[16].mxu1 %vm298_vm6, %v624_v1 }
 0x848   :  { %4319 = vmatprep.mubr.msk.f32.mxu1 %vm4699_vm5, %v4698_v11 }
 0x84d   :  { %4318 = vmatpush3.xpose.msk.msra.mxu1 %vm298_vm6, %v1131_v34 }
 0x84e   :  { %4327 = vmatprep.subr.mxu1 %v4698_v11 }
 0x850   :  { %4320 = vmatmul.mubr.msk.f32.vlgmr.msra.gmra.mrb[14].mxu1 %vm298_vm6, %v1129_v35 }
 0x851   :  { %4329 = vmatprep.mubr.msk.f32.mxu1 %vm4699_vm5, %v4698_v11 }
 0x8d4   :  { %v875_v38 = vpop.f32.mrb[6].mxu0 }
 0x8d5   :  { %v4294_v39 = vpop.f32.mrb[7].mxu0 }
 0x916   :  { %v951_v40 = vpop.f32.mrb[12].mxu1 }
 0x917   :  { %v955_v41 = vpack.c.bf16 %v951_v40, %v875_v38  ;;  %v4299_v42 = vpop.f32.mrb[13].mxu1  ;;  %v213_v40 = vld [vmem:[%s5438_s7 + $0x8] sm:$0xf] }
 0x919   :  { %4303 = vmatmul.mubr.msk.bf16.vlgmr.msra.gmra.mrb[8].mxu0 %vm298_vm6, %v955_v41  ;;  %v1385_v41 = vsel %vm79_vm0, %v213_v40, 0 }
 0x91a   :  { %4313 = vmatpush3.xpose.msk.msra.mxu0 %vm298_vm6, %v1053_v43  ;;  %v1043_v44 = vpop.f32.mrb[16].mxu1  ;;  %4314 = vmatprep.mubr.msk.f32.mxu0 %vm4699_vm5, %v4698_v11 }
 0x91b   :  { %v4310_v45 = vpop.f32.mrb[17].mxu1  ;;  %4322 = vmatprep.subr.mxu0 %v4698_v11 }
 0x91c   :  { %v1046_v46 = vpop.f32.mrb[18].mxu1 }
 0x91d   :  { %v4311_v47 = vpop.f32.mrb[19].mxu1 }
 0x921   :  { %4315 = vmatmul.mubr.msk.f32.vlgmr.msra.gmra.mrb[12].mxu0 %vm298_vm6, %v1051_v48 }
 0x922   :  { %4324 = vmatprep.mubr.msk.f32.mxu0 %vm4699_vm5, %v4698_v11 }
 0x923   :  { %v1202_v49 = vpop.f32.mrb[14].mxu1 }
 0x924   :  { %v1203_v50 = vadd.f32 %v1202_v49, %v4911_v29  ;;  %v4321_v51 = vpop.f32.mrb[15].mxu1 }
 0x926   :  { %v1209_v52 = vsel %vm298_vm6, %v1203_v50, -inf }
 0x927   :  { %1210 = vmax.xlane.f32.xlu1 %v1209_v52 }
 0x938   :  { %1432 = vrot.lane.b32.xlu1 %v4873_v7, %s4707_s3 }
 0x93c   :  { %1430 = vrot.lane.b32.xlu1 %v4873_v7, %s4708_s15 }
 0x940   :  { %1508 = vrot.lane.b32.xlu1 %v4879_v12, %s4708_s15 }
 0x9b4   :  { %v1211_v53 = vpop.xlane.xlu1 %1210 }
 0x9b5   :  { %v1213_v56 = vsub.f32 %v1203_v50, %v1211_v53 }
 0x9b7   :  { %v1216_v57 = vmul.f32 1.442695, %v1213_v56 }
 0x9b8   :  { %v1433_v14 = vpop.permute.xlu1 %1432 }
 0x9b9   :  { %4593 = vpow2.f32 %v1216_v57 }
 0x9bc   :  { %v1431_v17 = vpop.permute.xlu1 %1430 }
 0x9c0   :  { %v1509_v18 = vpop.permute.xlu1 %1508 }
 0x9c3   :  { %v4594_v58 = vpop.eup %4593 }
 0x9c4   :  { %v1221_v59 = vsel %vm298_vm6, %v4594_v58, 0.0 }
 0x9c5   :  { %1222 = vadd.xlane.f32.xlu0 %v1221_v59 }
 0x9db   :  { %1304 = vrot.lane.b32.xlu0 %v4879_v12, %s4709_s16 }
 0x9df   :  { %1510 = vrot.lane.b32.xlu0 %v4879_v12, %s4707_s3 }
 0x9ec   :  { %v996_v61 = vpop.f32.mrb[8].mxu0 }
 0x9ed   :  { %v5006_v62 = vadd.f32 %v1043_v44, %v996_v61  ;;  %v4304_v63 = vpop.f32.mrb[9].mxu0 }
 0x9ee   :  { %v999_v0 = vpop.f32.mrb[10].mxu0 }
 0x9ef   :  { %v5008_v1 = vadd.f32 %v1046_v46, %v999_v0  ;;  %v4305_v4 = vpop.f32.mrb[11].mxu0 }
 0x9f4   :  { %v1124_v5 = vpop.f32.mrb[12].mxu0 }
 0x9f5   :  { %v4316_v6 = vpop.f32.mrb[13].mxu0  ;;  %v1125_v8 = vadd.f32 %v1124_v5, %v4907_v24  ;;  %v214_v5 = vld [vmem:[%s5438_s7 + $0xc] sm:$0xf] }
 0x9f6   :  { %v1765_v6 = vsel %vm79_vm0, %v214_v5, 0  ;;  %v4562_v5 = vld [vmem:[%s5442_s11 + $0x8] sm:$0xff]  }
 0x9f7   :  { %v1206_v9 = vsel %vm298_vm6, %v1125_v8, -inf }
 0x9fe   :  { %1207 = vmax.xlane.f32.xlu0 %v1206_v9 }
 0xa14   :  { %1228 = vrot.lane.b32.xlu0 %v4873_v7, %s4709_s16 }
 0xa18   :  { %1608 = vrot.lane.b32.xlu0 %v4873_v7, %s4710_s17 }
 0xa52   :  { %v1223_v10 = vpop.xlane.xlu0 %1222 }
 0xa53   :  { %4595 = vrcp.f32 %v1223_v10 }
 0xa56   :  { %v1305_v13 = vpop.permute.xlu0 %1304 }
 0xa57   :  { %4328 = vmatpush3.msra.mxu1 %v1305_v13 }
 0xa58   :  { %4338 = vmatprep.subr.mxu1 %v4698_v11 }
 0xa5a   :  { %v1511_v7 = vpop.permute.xlu0 %1510 }
 0xa5d   :  { %v4596_v15 = vpop.eup %4595 }
 0xa5e   :  { %v1227_v16 = vmul.f32 %v4596_v15, %v4594_v58 }
 0xa60   :  { %4330 = vmatmul.mubr.msk.f32.vlgmr.msra.gmra.mrb[20].mxu1 %vm298_vm6, %v1227_v16 }
 0xa61   :  { %4339 = vmatpush3.xpose.msk.msra.mxu1 %vm298_vm6, %v1433_v14  ;;  %4340 = vmatprep.mubr.msk.f32.mxu1 %vm4699_vm5, %v4698_v11 }
 0xa62   :  { %4343 = vmatprep.subr.mxu1 %v4698_v11 }
 0xa64   :  { %4341 = vmatmul.mubr.msk.f32.vlgmr.msra.gmra.mrb[22].mxu1 %vm298_vm6, %v1431_v17 }
 0xa65   :  { %4344 = vmatpush3.xpose.msk.msra.mxu1 %vm298_vm6, %v1511_v7  ;;  %4345 = vmatprep.mubr.msk.f32.mxu1 %vm4699_vm5, %v4698_v11 }
 0xa66   :  { %4353 = vmatprep.subr.mxu1 %v4698_v11 }
 0xa68   :  { %4346 = vmatmul.mubr.msk.f32.vlgmr.msra.gmra.mrb[24].mxu1 %vm298_vm6, %v1509_v18 }
 0xa69   :  { %4355 = vmatprep.mubr.msk.f32.mxu1 %vm4699_vm5, %v4698_v11 }
 0xa8b   :  { %v1208_v19 = vpop.xlane.xlu0 %1207 }
 0xa8c   :  { %v1212_v20 = vsub.f32 %v1125_v8, %v1208_v19 }
 0xa8e   :  { %v1214_v21 = vmul.f32 1.442695, %v1212_v20  ;;  %v5072_v20 = vld [vmem:[%s5439_s8] sm:$0x3f] }
 0xa8f   :  { %v1229_v22 = vpop.permute.xlu0 %1228 }
 0xa90   :  { %4597 = vpow2.f32 %v1214_v21  ;;  %4323 = vmatpush3.msra.mxu0 %v1229_v22 }
 0xa91   :  { %4332 = vmatprep.subr.bf16.mxu0 %v4698_v11 }
 0xa93   :  { %v1609_v57 = vpop.permute.xlu0 %1608 }
 0xa9a   :  { %v4598_v23 = vpop.eup %4597 }
 0xa9b   :  { %v1218_v25 = vsel %vm298_vm6, %v4598_v23, 0.0 }
 0xa9c   :  { %1219 = vadd.xlane.f32.xlu1 %v1218_v25 }
 0xb29   :  { %v1220_v26 = vpop.xlane.xlu1 %1219 }
 0xb2a   :  { %4599 = vrcp.f32 %v1220_v26 }
 0xb33   :  { %v1376_v27 = vpop.f32.mrb[20].mxu1 }
 0xb34   :  { %v4600_v28 = vpop.eup %4599  ;;  %v4331_v30 = vpop.f32.mrb[21].mxu1 }
 0xb35   :  { %v1226_v31 = vmul.f32 %v4600_v28, %v4598_v23 }
 0xb37   :  { %4325 = vmatmul.mubr.msk.f32.vlgmr.msra.gmra.mrb[14].mxu0 %vm298_vm6, %v1226_v31  ;;  %v1504_v32 = vpop.f32.mrb[22].mxu1 }
 0xb38   :  { %v1505_v33 = vadd.f32 %v1504_v32, %v4907_v24  ;;  %v4342_v34 = vpop.f32.mrb[23].mxu1  ;;  %4334 = vmatprep.mubr.msk.bf16.mxu0 %vm4699_vm5, %v4698_v11  ;;  %4333 = vmatpush3.bf16.msra.mxu0 %v1385_v41 }
 0xb39   :  { %4348 = vmatprep.subr.mxu0 %v4698_v11 }
 0xb3a   :  { %v1586_v35 = vsel %vm298_vm6, %v1505_v33, -inf }
 0xb3b   :  { %1587 = vmax.xlane.f32.xlu1 %v1586_v35  ;;  %v1582_v36 = vpop.f32.mrb[24].mxu1 }
 0xb3c   :  { %v1583_v37 = vadd.f32 %v1582_v36, %v4911_v29  ;;  %v4347_v38 = vpop.f32.mrb[25].mxu1 }
 0xb3e   :  { %v1589_v39 = vsel %vm298_vm6, %v1583_v37, -inf }
 0xb3f   :  { %1590 = vmax.xlane.f32.xlu1 %v1589_v39 }
 0xbc8   :  { %v1588_v42 = vpop.xlane.xlu1 %1587 }
 0xbc9   :  { %v1592_v43 = vsub.f32 %v1505_v33, %v1588_v42  ;;  %v4559_v42 = vld [vmem:[%s5440_s9] sm:$0xff]  }
 0xbcb   :  { %v1594_v44 = vmul.f32 1.442695, %v1592_v43  ;;  %v4560_v43 = vld [vmem:[%s5440_s9 + $0x8] sm:$0xff]  }
 0xbcc   :  { %v1591_v45 = vpop.xlane.xlu1 %1590 }
 0xbcd   :  { %4601 = vpow2.f32 %v1594_v44  ;;  %v1593_v46 = vsub.f32 %v1583_v37, %v1591_v45 }
 0xbcf   :  { %v1596_v47 = vmul.f32 1.442695, %v1593_v46 }
 0xbd1   :  { %4603 = vpow2.f32 %v1596_v47 }
 0xbd7   :  { %v4602_v48 = vpop.eup %4601 }
 0xbd8   :  { %v1598_v49 = vsel %vm298_vm6, %v4602_v48, 0.0 }
 0xbd9   :  { %1599 = vadd.xlane.f32.xlu1 %v1598_v49 }
 0xbdb   :  { %v4604_v50 = vpop.eup %4603 }
 0xbdc   :  { %v1601_v51 = vsel %vm298_vm6, %v4604_v50, 0.0 }
 0xbdd   :  { %1602 = vadd.xlane.f32.xlu1 %v1601_v51  ;;  %v1847_v51 = vrot.slane %v5072_v20, %v4858_v60 }
 0xbee   :  { %1684 = vrot.lane.b32.xlu1 %v4879_v12, %s4710_s17 }
 0xc0a   :  { %v1300_v52 = vpop.f32.mrb[14].mxu0 }
 0xc0b   :  { %v1380_v53 = vpack.c.bf16 %v1376_v27, %v1300_v52  ;;  %v4326_v56 = vpop.f32.mrb[15].mxu0 }
 0xc0d   :  { %4335 = vmatmul.mubr.msk.bf16.vlgmr.msra.gmra.mrb[16].mxu0 %vm298_vm6, %v1380_v53  ;;  %v1852_v53 = vsub.s32 2, %v4848_v54 }
 0xc0e   :  { %4349 = vmatpush3.msra.mxu0 %v1609_v57  ;;  %4350 = vmatprep.mubr.msk.f32.mxu0 %vm4699_vm5, %v4698_v11 }
 0xc0f   :  { %4358 = vmatprep.subr.bf16.mxu0 %v4698_v11 }
 0xc66   :  { %v1600_v58 = vpop.xlane.xlu1 %1599 }
 0xc67   :  { %4605 = vrcp.f32 %v1600_v58 }
 0xc6a   :  { %v1603_v59 = vpop.xlane.xlu1 %1602 }
 0xc6b   :  { %4607 = vrcp.f32 %v1603_v59  ;;  %v1853_v59 = vrot.slane %v5072_v20, %v1852_v53 }
 0xc6e   :  { %v1685_v61 = vpop.permute.xlu1 %1684 }
 0xc6f   :  { %4354 = vmatpush3.msra.mxu1 %v1685_v61 }
 0xc70   :  { %4364 = vmatprep.subr.bf16.mxu1 %v4698_v11 }
 0xc71   :  { %v4606_v12 = vpop.eup %4605 }
 0xc72   :  { %v1606_v63 = vmul.f32 %v4606_v12, %v4602_v48 }
 0xc74   :  { %4351 = vmatmul.mubr.msk.f32.vlgmr.msra.gmra.mrb[20].mxu0 %vm298_vm6, %v1606_v63 }
 0xc75   :  { %v4608_v0 = vpop.eup %4607  ;;  %4360 = vmatprep.mubr.msk.bf16.mxu0 %vm4699_vm5, %v4698_v11  ;;  %4359 = vmatpush3.bf16.msra.mxu0 %v1765_v6  ;;  %v4563_v6 = vld [vmem:[%s5442_s11 + $0x10] sm:$0xff]  }
 0xc76   :  { %v1607_v4 = vmul.f32 %v4608_v0, %v4604_v50  ;;  %4372 = vmatprep.subr.bf16.mxu0 %v4698_v11 }
 0xc78   :  { %4356 = vmatmul.mubr.msk.f32.vlgmr.msra.gmra.mrb[26].mxu1 %vm298_vm6, %v1607_v4  ;;  %v4561_v4 = vld [vmem:[%s5442_s11] sm:$0xff]  }
 0xc79   :  { %4368 = vmatprep.mubr.msk.bf16.mxu1 %vm4699_vm5, %v4698_v11  ;;  %4365 = vmatpush3.bf16.msra.mxu1 %v4559_v42 }
 0xc7a   :  { %4366 = vmatprep.subr.bf16.mxu1 %v4698_v11 }
 0xc7d   :  { %4367 = vmatpush3.bf16.msra.mxu1 %v4560_v43 }
 0xc7e   :  { %4384 = vmatprep.subr.bf16.mxu1 %v4698_v11 }
 0xce0   :  { %v1421_v8 = vpop.f32.mrb[16].mxu0 }
 0xce1   :  { %v1428_v9 = vadd.f32 %v1421_v8, %v5006_v62  ;;  %v4336_v10 = vpop.f32.mrb[17].mxu0  ;;  %v4564_v8 = vld [vmem:[%s5442_s11 + $0x18] sm:$0xff]  }
 0xce2   :  { %v1424_v13 = vpop.f32.mrb[18].mxu0 }
 0xce3   :  { %v1429_v14 = vadd.f32 %v1424_v13, %v5008_v1  ;;  %v4337_v15 = vpop.f32.mrb[19].mxu0  ;;  %v1815_v1 = vrot.slane %v5072_v20, %v4851_v55 }
 0xd47   :  { %v1680_v16 = vpop.f32.mrb[20].mxu0 }
 0xd48   :  { %v4352_v17 = vpop.f32.mrb[21].mxu0 }
 0xd4b   :  { %v1756_v7 = vpop.f32.mrb[26].mxu1 }
 0xd4c   :  { %v1760_v18 = vpack.c.bf16 %v1756_v7, %v1680_v16  ;;  %v4357_v19 = vpop.f32.mrb[27].mxu1 }
 0xd4e   :  { %4361 = vmatmul.mubr.msk.bf16.vlgmr.msra.gmra.mrb[24].mxu0 %vm298_vm6, %v1760_v18 }
 0xd4f   :  { %4380 = vmatprep.mubr.msk.bf16.mxu0 %vm4699_vm5, %v4698_v11  ;;  %4373 = vmatpush3.bf16.msra.mxu0 %v4561_v4 }
 0xd50   :  { %4374 = vmatprep.subr.bf16.mxu0 %v4698_v11 }
 0xd53   :  { %4375 = vmatpush3.bf16.msra.mxu0 %v4562_v5 }
 0xd54   :  { %4376 = vmatprep.subr.bf16.mxu0 %v4698_v11 }
 0xd57   :  { %4377 = vmatpush3.bf16.msra.mxu0 %v4563_v6 }
 0xd58   :  { %4378 = vmatprep.subr.bf16.mxu0 %v4698_v11 }
 0xd5b   :  { %4379 = vmatpush3.bf16.msra.mxu0 %v4564_v8 }
 0xd5c   :  { %4397 = vmatprep.subr.mxu0 %v4698_v11 }
 0xe21   :  { %v1801_v62 = vpop.f32.mrb[24].mxu0 }
 0xe22   :  { %v1808_v21 = vadd.f32 %v1801_v62, %v1428_v9  ;;  %v4362_v22 = vpop.f32.mrb[25].mxu0  ;;  %v4033_v9 = vld [vmem:[%s5441_s10] ss:$0 sm:$0xff] }
 0xe23   :  { %v1804_v23 = vpop.f32.mrb[26].mxu0 }
 0xe24   :  { %v1810_v25 = vadd.f32 %v1808_v21, %v4861_v2  ;;  %v1809_v26 = vadd.f32 %v1804_v23, %v1429_v14  ;;  %v4363_v27 = vpop.f32.mrb[27].mxu0 }
 0xe26   :  { %v1811_v28 = vadd.f32 %v1809_v26, %v4863_v3  ;;  %v1816_v30 = vadd.f32 %v1815_v1, %v1810_v25 }
 0xe28   :  { %v1818_v31 = vsel %vm162_vm4, %v1816_v30, 0.0  ;;  %v1817_v32 = vadd.f32 %v1815_v1, %v1811_v28 }
 0xe29   :  { %1819 = vadd.xlane.f32.xlu0 %v1818_v31 }
 0xe2a   :  { %v1821_v33 = vsel %vm162_vm4, %v1817_v32, 0.0 }
 0xe2b   :  { %1822 = vadd.xlane.f32.xlu1 %v1821_v33 }
 0xeb6   :  { %v1820_v34 = vpop.xlane.xlu0 %1819 }
 0xeb7   :  { %v1824_v35 = vmul.f32 0.03125, %v1820_v34 }
 0xeb8   :  { %v1823_v36 = vpop.xlane.xlu1 %1822 }
 0xeb9   :  { %v1826_v37 = vsub.f32 %v1816_v30, %v1824_v35  ;;  %v1825_v38 = vmul.f32 0.03125, %v1823_v36 }
 0xebb   :  { %v1827_v39 = vsub.f32 %v1817_v32, %v1825_v38  ;;  %v1828_v40 = vmul.f32 %v1826_v37, %v1826_v37 }
 0xebd   :  { %v1830_v2 = vsel %vm162_vm4, %v1828_v40, 0.0  ;;  %v1829_v41 = vmul.f32 %v1827_v39, %v1827_v39 }
 0xebe   :  { %1831 = vadd.xlane.f32.xlu0 %v1830_v2 }
 0xebf   :  { %v1833_v3 = vsel %vm162_vm4, %v1829_v41, 0.0 }
 0xec2   :  { %1834 = vadd.xlane.f32.xlu0 %v1833_v3 }
 0xf4b   :  { %v1832_v44 = vpop.xlane.xlu0 %1831 }
 0xf4c   :  { %v1836_v45 = vmul.f32 0.03125, %v1832_v44 }
 0xf4e   :  { %v1838_v46 = vadd.f32 1e-12, %v1836_v45 }
 0xf4f   :  { %v1835_v47 = vpop.xlane.xlu0 %1834 }
 0xf50   :  { %4609 = vrsqrt.f32 %v1838_v46  ;;  %v1837_v48 = vmul.f32 0.03125, %v1835_v47 }
 0xf52   :  { %v1839_v49 = vadd.f32 1e-12, %v1837_v48 }
 0xf54   :  { %4611 = vrsqrt.f32 %v1839_v49 }
 0xf5a   :  { %v4610_v50 = vpop.eup %4609 }
 0xf5b   :  { %v1842_v52 = vmul.f32 %v4610_v50, %v1826_v37 }
 0xf5d   :  { %v1848_v57 = vmul.f32 %v1847_v51, %v1842_v52 }
 0xf5e   :  { %v4612_v56 = vpop.eup %4611 }
 0xf5f   :  { %v1843_v58 = vmul.f32 %v4612_v56, %v1827_v39  ;;  %v5096_v12 = vadd.f32 %v1853_v59, %v1848_v57  ;;  %v4711_v57 = vmov -1.0  }
 0xf61   :  { %v1849_v61 = vmul.f32 %v1847_v51, %v1843_v58 }
 0xf63   :  { %v5098_v63 = vadd.f32 %v1853_v59, %v1849_v61 }
 0xf65   :  { %v1856_v0 = vpack.c.bf16 %v5098_v63, %v5096_v12 }
 0xf67   :  { %4369 = vmatmul.mubr.msk.bf16.vlgmr.msra.gmra.mrb[28].mxu1 %vm162_vm4, %v1856_v0 }
 0xf68   :  { %4388 = vmatprep.mubr.msk.bf16.mxu1 %vm4699_vm5, %v4698_v11 }
0x103a   :  { %v1917_v10 = vpop.f32.mrb[28].mxu1 }
0x103b   :  { %v1918_v13 = vadd.f32 %v4033_v9, %v1917_v10  ;;  %v4370_v14 = vpop.f32.mrb[29].mxu1 }
0x103c   :  { %v1920_v15 = vpop.f32.mrb[30].mxu1 }
0x103d   :  { %v1926_v16 = vmul.f32 0.70710677, %v1918_v13  ;;  %v1921_v17 = vadd.f32 %v4033_v9, %v1920_v15  ;;  %v4371_v7 = vpop.f32.mrb[31].mxu1  ;;  %v1924_v8 = vmul.f32 0.5, %v1918_v13 }
0x103e   :  { %v1987_v7 = vsub.s32 3, %v4848_v54 }
0x103f   :  { %v1932_v18 = vand.u32 2147483647, %v1926_v16  ;;  %v1927_v19 = vmul.f32 0.70710677, %v1921_v17  ;;  %vm1928_vm7 = vcmp.ge.f32.partialorder %v1926_v16, 0.0  ;;  %v1925_v9 = vmul.f32 0.5, %v1921_v17 }
0x1040   :  { %v1930_v58 = vsel %vm1928_vm7, 1.0, %v4711_v57 }
0x1041   :  { %v1934_v62 = vmul.f32 0.3275911, %v1932_v18  ;;  %v1933_v21 = vand.u32 2147483647, %v1927_v19  ;;  %v1958_v25 = vsub.f32 0.0, %v1932_v18  ;;  %vm1929_vm8 = vcmp.ge.f32.partialorder %v1927_v19, 0.0 }
0x1042   :  { %v1931_v4 = vsel %vm1929_vm8, 1.0, %v4711_v57 }
0x1043   :  { %v1936_v22 = vadd.f32 1.0, %v1934_v62  ;;  %v1935_v1 = vmul.f32 0.3275911, %v1933_v21  ;;  %v1959_v26 = vsub.f32 0.0, %v1933_v21  ;;  %v1960_v28 = vmul.f32 %v1958_v25, %v1932_v18 }
0x1044   :  { %v1988_v18 = vrot.slane %v5072_v20, %v1987_v7 }
0x1045   :  { %4613 = vrcp.f32 %v1936_v22  ;;  %v1937_v23 = vadd.f32 1.0, %v1935_v1  ;;  %v1961_v33 = vmul.f32 %v1959_v26, %v1933_v21  ;;  %v1962_v34 = vmul.f32 1.442695, %v1960_v28 }
0x1047   :  { %4615 = vrcp.f32 %v1937_v23  ;;  %v1964_v39 = vmul.f32 1.442695, %v1961_v33 }
0x1048   :  { %4617 = vpow2.f32 %v1962_v34 }
0x1049   :  { %4619 = vpow2.f32 %v1964_v39 }
0x104f   :  { %v4614_v27 = vpop.eup %4613 }
0x1050   :  { %v1940_v30 = vmul.f32 1.0614054, %v4614_v27 }
0x1051   :  { %v4616_v31 = vpop.eup %4615 }
0x1052   :  { %v1942_v32 = vadd.f32 -1.4531521, %v1940_v30  ;;  %v1941_v35 = vmul.f32 1.0614054, %v4616_v31  ;;  %v4618_v48 = vpop.eup %4617 }
0x1053   :  { %v4620_v52 = vpop.eup %4619 }
0x1054   :  { %v1944_v36 = vmul.f32 %v4614_v27, %v1942_v32  ;;  %v1943_v37 = vadd.f32 -1.4531521, %v1941_v35 }
0x1056   :  { %v1946_v38 = vadd.f32 1.4214138, %v1944_v36  ;;  %v1945_v40 = vmul.f32 %v4616_v31, %v1943_v37  ;;  %v4566_v37 = vld [vmem:[%s5436_s5 + $0x18] sm:$0xff]  }
0x1058   :  { %v1948_v2 = vmul.f32 %v4614_v27, %v1946_v38  ;;  %v1947_v41 = vadd.f32 1.4214138, %v1945_v40 }
0x105a   :  { %v1950_v3 = vadd.f32 -0.28449672, %v1948_v2  ;;  %v1949_v42 = vmul.f32 %v4616_v31, %v1947_v41 }
0x105c   :  { %v1952_v43 = vmul.f32 %v4614_v27, %v1950_v3  ;;  %v1951_v44 = vadd.f32 -0.28449672, %v1949_v42  ;;  %v2088_v42 = vsub.s32 4, %v4848_v54 }
0x105e   :  { %v1954_v45 = vadd.f32 0.2548296, %v1952_v43  ;;  %v1953_v46 = vmul.f32 %v4616_v31, %v1951_v44  ;;  %v2089_v44 = vrot.slane %v5072_v20, %v2088_v42 }
0x1060   :  { %v1956_v47 = vmul.f32 %v4614_v27, %v1954_v45  ;;  %v1955_v49 = vadd.f32 0.2548296, %v1953_v46  ;;  %v2094_v46 = vsub.s32 5, %v4848_v54 }
0x1062   :  { %v1966_v50 = vmul.f32 %v4618_v48, %v1956_v47  ;;  %v1957_v51 = vmul.f32 %v4616_v31, %v1955_v49 }
0x1064   :  { %v1968_v56 = vsub.f32 1.0, %v1966_v50  ;;  %v1967_v59 = vmul.f32 %v4620_v52, %v1957_v51  ;;  %v2095_v50 = vrot.slane %v5072_v20, %v2094_v46 }
0x1066   :  { %v1970_v61 = vmul.f32 %v1968_v56, %v1930_v58  ;;  %v1969_v0 = vsub.f32 1.0, %v1967_v59  ;;  %v4052_v59 = vld [vmem:[%s5437_s6 + $0x1] ss:$0 sm:$0xff] }
0x1068   :  { %v1972_v5 = vadd.f32 1.0, %v1970_v61  ;;  %v1971_v6 = vmul.f32 %v1969_v0, %v1931_v4 }
0x106a   :  { %v1973_v10 = vadd.f32 1.0, %v1971_v6  ;;  %v1974_v14 = vmul.f32 %v1972_v5, %v1924_v8 }
0x106c   :  { %v1975_v15 = vmul.f32 %v1973_v10, %v1925_v9 }
0x106e   :  { %v1976_v16 = vpack.c.bf16 %v1975_v15, %v1974_v14 }
0x1070   :  { %4381 = vmatmul.mubr.msk.bf16.vlgmr.msra.gmra.mrb[28].mxu0 %vm2013_vm9, %v1976_v16 }
0x1071   :  { %4399 = vmatprep.mubr.msk.f32.mxu0 %vm4699_vm5, %v4698_v11 }
0x1143   :  { %v2051_v19 = vpop.f32.mrb[28].mxu0 }
0x1144   :  { %v2052_v62 = vadd.f32 %v2051_v19, %v1988_v18  ;;  %v4382_v13 = vpop.f32.mrb[29].mxu0 }
0x1145   :  { %v2054_v17 = vpop.f32.mrb[30].mxu0 }
0x1146   :  { %v2055_v21 = vadd.f32 %v2054_v17, %v1988_v18  ;;  %v4383_v22 = vpop.f32.mrb[31].mxu0  ;;  %v2058_v1 = vadd.f32 %v2052_v62, %v5096_v12 }
0x1148   :  { %v2060_v23 = vsel %vm162_vm4, %v2058_v1, 0.0  ;;  %v2059_v25 = vadd.f32 %v2055_v21, %v5098_v63  ;;  %v4565_v63 = vld [vmem:[%s5436_s5 + $0x10] sm:$0xff]  }
0x1149   :  { %2061 = vadd.xlane.f32.xlu0 %v2060_v23  ;;  %4385 = vmatpush3.bf16.msra.mxu1 %v4565_v63 }
0x114a   :  { %v2063_v26 = vsel %vm162_vm4, %v2059_v25, 0.0  ;;  %4386 = vmatprep.subr.bf16.mxu1 %v4698_v11 }
0x114d   :  { %2064 = vadd.xlane.f32.xlu0 %v2063_v26  ;;  %4387 = vmatpush3.bf16.msra.mxu1 %v4566_v37 }
0x114e   :  { %4392 = vmatprep.subr.mxu1 %v4698_v11 }
0x11d6   :  { %v2062_v27 = vpop.xlane.xlu0 %2061 }
0x11d7   :  { %v2066_v28 = vmul.f32 0.03125, %v2062_v27 }
0x11d9   :  { %v2068_v30 = vsub.f32 %v2058_v1, %v2066_v28 }
0x11da   :  { %v2065_v31 = vpop.xlane.xlu0 %2064 }
0x11db   :  { %v2067_v32 = vmul.f32 0.03125, %v2065_v31  ;;  %v2070_v33 = vmul.f32 %v2068_v30, %v2068_v30 }
0x11dd   :  { %v2069_v34 = vsub.f32 %v2059_v25, %v2067_v32  ;;  %v2072_v35 = vsel %vm162_vm4, %v2070_v33, 0.0 }
0x11de   :  { %2073 = vadd.xlane.f32.xlu0 %v2072_v35 }
0x11df   :  { %v2071_v36 = vmul.f32 %v2069_v34, %v2069_v34 }
0x11e1   :  { %v2075_v12 = vsel %vm162_vm4, %v2071_v36, 0.0 }
0x11e2   :  { %2076 = vadd.xlane.f32.xlu1 %v2075_v12 }
0x126b   :  { %v2074_v38 = vpop.xlane.xlu0 %2073 }
0x126c   :  { %v2078_v39 = vmul.f32 0.03125, %v2074_v38 }
0x126e   :  { %v2080_v40 = vadd.f32 1e-12, %v2078_v39 }
0x126f   :  { %v2077_v2 = vpop.xlane.xlu1 %2076 }
0x1270   :  { %4621 = vrsqrt.f32 %v2080_v40  ;;  %v2079_v41 = vmul.f32 0.03125, %v2077_v2 }
0x1272   :  { %v2081_v3 = vadd.f32 1e-12, %v2079_v41 }
0x1274   :  { %4623 = vrsqrt.f32 %v2081_v3 }
0x127a   :  { %v4622_v43 = vpop.eup %4621 }
0x127b   :  { %v2084_v45 = vmul.f32 %v4622_v43, %v2068_v30 }
0x127d   :  { %v2090_v48 = vmul.f32 %v2089_v44, %v2084_v45 }
0x127e   :  { %v4624_v47 = vpop.eup %4623 }
0x127f   :  { %v2085_v49 = vmul.f32 %v4624_v47, %v2069_v34  ;;  %v5155_v52 = vadd.f32 %v2095_v50, %v2090_v48 }
0x1281   :  { %v2091_v51 = vmul.f32 %v2089_v44, %v2085_v49 }
0x1283   :  { %v5157_v56 = vadd.f32 %v2095_v50, %v2091_v51 }
0x1285   :  { %v2105_v58 = vpack.c.bf16 %v5157_v56, %v5155_v52 }
0x1287   :  { %4389 = vmatmul.mubr.msk.bf16.vlgmr.msra.gmra.mrb[32].mxu1 %vm162_vm4, %v2105_v58 }
0x1288   :  { %4394 = vmatprep.mubr.msk.f32.mxu1 %vm4699_vm5, %v4698_v11 }
0x135a   :  { %v2168_v61 = vpop.f32.mrb[32].mxu1 }
0x135b   :  { %v5167_v0 = vadd.f32 %v4052_v59, %v2168_v61  ;;  %v4390_v20 = vpop.f32.mrb[33].mxu1 }
0x135c   :  { %v2171_v4 = vpop.f32.mrb[34].mxu1 }
0x135d   :  { %v5169_v5 = vadd.f32 %v4052_v59, %v2171_v4  ;;  %2176 = vrot.lane.b32.xlu0 %v5167_v0, %s4701_s21  ;;  %v4391_v6 = vpop.f32.mrb[35].mxu1 }
0x135f   :  { %2253 = vrot.lane.b32.xlu1 %v5169_v5, %s4701_s21 }
0x13cf   :  { %v2177_v8 = vpop.permute.xlu0 %2176 }
0x13d0   :  { %4393 = vmatpush3.xpose.msk.msra.mxu1 %vm298_vm6, %v2177_v8 }
0x13d1   :  { %v2254_v9 = vpop.permute.xlu1 %2253  ;;  %4402 = vmatprep.subr.mxu1 %v4698_v11 }
0x13d2   :  { %4398 = vmatpush3.xpose.msk.msra.mxu0 %vm298_vm6, %v2254_v9 }
0x13d3   :  { %4395 = vmatmul.mubr.msk.f32.vlgmr.msra.gmra.mrb[36].mxu1 %vm298_vm6, %v5167_v0  ;;  %4407 = vmatprep.subr.mxu0 %v4698_v11 }
0x13d4   :  { %4404 = vmatprep.mubr.msk.f32.mxu1 %vm4699_vm5, %v4698_v11 }
0x13d5   :  { %4400 = vmatmul.mubr.msk.f32.vlgmr.msra.gmra.mrb[22].mxu0 %vm298_vm6, %v5169_v5 }
0x13d6   :  { %4409 = vmatprep.mubr.msk.f32.mxu0 %vm4699_vm5, %v4698_v11 }
0x14a6   :  { %v2248_v10 = vpop.f32.mrb[36].mxu1 }
0x14a7   :  { %v2249_v14 = vadd.f32 %v2248_v10, %v4907_v24  ;;  %v4396_v15 = vpop.f32.mrb[37].mxu1 }
0x14a8   :  { %v2325_v16 = vpop.f32.mrb[22].mxu0 }
0x14a9   :  { %v2326_v18 = vadd.f32 %v2325_v16, %v4911_v29  ;;  %v4401_v19 = vpop.f32.mrb[23].mxu0  ;;  %v2329_v62 = vsel %vm298_vm6, %v2249_v14, -inf }
0x14aa   :  { %2330 = vmax.xlane.f32.xlu1 %v2329_v62 }
0x14ab   :  { %v2332_v13 = vsel %vm298_vm6, %v2326_v18, -inf }
0x14ac   :  { %2333 = vmax.xlane.f32.xlu0 %v2332_v13 }
0x14bb   :  { %2427 = vrot.lane.b32.xlu1 %v5169_v5, %s4700_s0 }
0x14bf   :  { %2506 = vrot.lane.b32.xlu1 %v5167_v0, %s4702_s22 }
0x14c2   :  { %2351 = vrot.lane.b32.xlu0 %v5167_v0, %s4700_s0 }
0x14c6   :  { %2584 = vrot.lane.b32.xlu0 %v5169_v5, %s4702_s22 }
0x1537   :  { %v2331_v17 = vpop.xlane.xlu1 %2330 }
0x1538   :  { %v2335_v21 = vsub.f32 %v2249_v14, %v2331_v17  ;;  %v4044_v17 = vld [vmem:[%s5438_s7 + $0x14] sm:$0xf] }
0x1539   :  { %v2334_v22 = vpop.xlane.xlu0 %2333 }
0x153a   :  { %v2337_v1 = vmul.f32 1.442695, %v2335_v21  ;;  %v2336_v23 = vsub.f32 %v2326_v18, %v2334_v22  ;;  %v4043_v22 = vld [vmem:[%s5438_s7 + $0x10] sm:$0xf] }
0x153b   :  { %v2428_v25 = vpop.permute.xlu1 %2427 }
0x153c   :  { %4625 = vpow2.f32 %v2337_v1  ;;  %v2339_v26 = vmul.f32 1.442695, %v2336_v23  ;;  %4408 = vmatpush3.msra.mxu0 %v2428_v25  ;;  %v2839_v23 = vsel %vm79_vm0, %v4044_v17, 0 }
0x153d   :  { %v2352_v27 = vpop.permute.xlu0 %2351  ;;  %4417 = vmatprep.subr.mxu0 %v4698_v11 }
0x153e   :  { %4627 = vpow2.f32 %v2339_v26  ;;  %4403 = vmatpush3.msra.mxu1 %v2352_v27  ;;  %v2886_v27 = vsel %vm79_vm0, %v4043_v22, 0 }
0x153f   :  { %4412 = vmatprep.subr.mxu1 %v4698_v11  ;;  %v2507_v34 = vpop.permute.xlu1 %2506 }
0x1541   :  { %v2585_v33 = vpop.permute.xlu0 %2584 }
0x1546   :  { %v4626_v28 = vpop.eup %4625 }
0x1547   :  { %v2341_v30 = vsel %vm298_vm6, %v4626_v28, 0.0 }
0x1548   :  { %v4628_v31 = vpop.eup %4627  ;;  %2342 = vadd.xlane.f32.xlu0 %v2341_v30 }
0x1549   :  { %v2344_v32 = vsel %vm298_vm6, %v4628_v31, 0.0 }
0x154a   :  { %2345 = vadd.xlane.f32.xlu1 %v2344_v32 }
0x155b   :  { %2504 = vrot.lane.b32.xlu1 %v5167_v0, %s4703_s1 }
0x155e   :  { %2582 = vrot.lane.b32.xlu0 %v5169_v5, %s4703_s1 }
0x15d5   :  { %v2343_v35 = vpop.xlane.xlu0 %2342 }
0x15d6   :  { %4629 = vrcp.f32 %v2343_v35 }
0x15d7   :  { %v2346_v36 = vpop.xlane.xlu1 %2345 }
0x15d8   :  { %4631 = vrcp.f32 %v2346_v36 }
0x15d9   :  { %v2583_v40 = vpop.permute.xlu0 %2582 }
0x15db   :  { %v2505_v39 = vpop.permute.xlu1 %2504 }
0x15e0   :  { %v4630_v12 = vpop.eup %4629 }
0x15e1   :  { %v2349_v63 = vmul.f32 %v4630_v12, %v4626_v28 }
0x15e2   :  { %v4632_v37 = vpop.eup %4631 }
0x15e3   :  { %v2350_v38 = vmul.f32 %v4632_v37, %v4628_v31  ;;  %4405 = vmatmul.mubr.msk.f32.vlgmr.msra.gmra.mrb[38].mxu1 %vm298_vm6, %v2349_v63 }
0x15e4   :  { %4413 = vmatpush3.xpose.msk.msra.mxu1 %vm298_vm6, %v2507_v34  ;;  %4414 = vmatprep.mubr.msk.f32.mxu1 %vm4699_vm5, %v4698_v11 }
0x15e5   :  { %4410 = vmatmul.mubr.msk.f32.vlgmr.msra.gmra.mrb[32].mxu0 %vm298_vm6, %v2350_v38  ;;  %4422 = vmatprep.subr.mxu1 %v4698_v11 }
0x15e6   :  { %4418 = vmatpush3.xpose.msk.msra.mxu0 %vm298_vm6, %v2585_v33  ;;  %4419 = vmatprep.mubr.msk.f32.mxu0 %vm4699_vm5, %v4698_v11 }
0x15e7   :  { %4415 = vmatmul.mubr.msk.f32.vlgmr.msra.gmra.mrb[40].mxu1 %vm298_vm6, %v2505_v39  ;;  %4427 = vmatprep.subr.mxu0 %v4698_v11 }
0x15e8   :  { %4424 = vmatprep.mubr.msk.f32.mxu1 %vm4699_vm5, %v4698_v11 }
0x15e9   :  { %4420 = vmatmul.mubr.msk.f32.vlgmr.msra.gmra.mrb[34].mxu0 %vm298_vm6, %v2583_v40 }
0x15ea   :  { %4429 = vmatprep.mubr.msk.f32.mxu0 %vm4699_vm5, %v4698_v11 }
0x16b6   :  { %v2423_v2 = vpop.f32.mrb[38].mxu1 }
0x16b7   :  { %v4406_v41 = vpop.f32.mrb[39].mxu1 }
0x16b8   :  { %v2499_v3 = vpop.f32.mrb[32].mxu0 }
0x16b9   :  { %v2503_v43 = vpack.c.bf16 %v2499_v3, %v2423_v2  ;;  %v4411_v44 = vpop.f32.mrb[33].mxu0 }
0x16ba   :  { %v2578_v45 = vpop.f32.mrb[40].mxu1 }
0x16bb   :  { %v2579_v47 = vadd.f32 %v2578_v45, %v4907_v24  ;;  %v4416_v48 = vpop.f32.mrb[41].mxu1 }
0x16bc   :  { %v2656_v49 = vpop.f32.mrb[34].mxu0 }
0x16bd   :  { %v2657_v50 = vadd.f32 %v2656_v49, %v4911_v29  ;;  %v4421_v51 = vpop.f32.mrb[35].mxu0  ;;  %v2660_v58 = vsel %vm298_vm6, %v2579_v47, -inf }
0x16be   :  { %2661 = vmax.xlane.f32.xlu1 %v2660_v58 }
0x16bf   :  { %v2663_v59 = vsel %vm298_vm6, %v2657_v50, -inf }
0x16c0   :  { %2664 = vmax.xlane.f32.xlu0 %v2663_v59 }
0x174b   :  { %v2662_v61 = vpop.xlane.xlu1 %2661 }
0x174c   :  { %v2666_v20 = vsub.f32 %v2579_v47, %v2662_v61 }
0x174d   :  { %v2665_v4 = vpop.xlane.xlu0 %2664 }
0x174e   :  { %v2668_v6 = vmul.f32 1.442695, %v2666_v20  ;;  %v2667_v8 = vsub.f32 %v2657_v50, %v2665_v4 }
0x1750   :  { %4633 = vpow2.f32 %v2668_v6  ;;  %v2670_v9 = vmul.f32 1.442695, %v2667_v8 }
0x1752   :  { %4635 = vpow2.f32 %v2670_v9 }
0x175a   :  { %v4634_v10 = vpop.eup %4633 }
0x175b   :  { %v2672_v14 = vsel %vm298_vm6, %v4634_v10, 0.0 }
0x175c   :  { %v4636_v15 = vpop.eup %4635  ;;  %2673 = vadd.xlane.f32.xlu0 %v2672_v14 }
0x175d   :  { %v2675_v16 = vsel %vm298_vm6, %v4636_v15, 0.0 }
0x175e   :  { %2676 = vadd.xlane.f32.xlu1 %v2675_v16 }
0x176f   :  { %2758 = vrot.lane.b32.xlu1 %v5169_v5, %s4704_s27 }
0x1772   :  { %2682 = vrot.lane.b32.xlu0 %v5167_v0, %s4704_s27 }
0x1773   :  { %3009 = vrot.lane.b32.xlu1 %v5169_v5, %s4706_s29 }
0x1776   :  { %3007 = vrot.lane.b32.xlu0 %v5169_v5, %s4705_s28 }
0x1777   :  { %2931 = vrot.lane.b32.xlu1 %v5167_v0, %s4706_s29 }
0x177a   :  { %2929 = vrot.lane.b32.xlu0 %v5167_v0, %s4705_s28 }
0x17e9   :  { %v2674_v18 = vpop.xlane.xlu0 %2673 }
0x17ea   :  { %4637 = vrcp.f32 %v2674_v18 }
0x17eb   :  { %v2677_v19 = vpop.xlane.xlu1 %2676 }
0x17ec   :  { %4639 = vrcp.f32 %v2677_v19 }
0x17ed   :  { %v2683_v62 = vpop.permute.xlu0 %2682 }
0x17ee   :  { %4423 = vmatpush3.msra.mxu1 %v2683_v62 }
0x17ef   :  { %v2759_v13 = vpop.permute.xlu1 %2758  ;;  %4432 = vmatprep.subr.bf16.mxu1 %v4698_v11 }
0x17f0   :  { %4428 = vmatpush3.msra.mxu0 %v2759_v13 }
0x17f1   :  { %4438 = vmatprep.subr.bf16.mxu0 %v4698_v11  ;;  %v3008_v30 = vpop.permute.xlu0 %3007 }
0x17f3   :  { %v3010_v28 = vpop.permute.xlu1 %3009 }
0x17f4   :  { %v4638_v21 = vpop.eup %4637 }
0x17f5   :  { %v2680_v1 = vmul.f32 %v4638_v21, %v4634_v10  ;;  %v2930_v39 = vpop.permute.xlu0 %2929 }
0x17f6   :  { %v4640_v25 = vpop.eup %4639 }
0x17f7   :  { %v2681_v26 = vmul.f32 %v4640_v25, %v4636_v15  ;;  %4425 = vmatmul.mubr.msk.f32.vlgmr.msra.gmra.mrb[42].mxu1 %vm298_vm6, %v2680_v1  ;;  %v2932_v36 = vpop.permute.xlu1 %2931 }
0x17f8   :  { %4433 = vmatpush3.bf16.msra.mxu1 %v2839_v23  ;;  %4434 = vmatprep.mubr.msk.bf16.mxu1 %vm4699_vm5, %v4698_v11 }
0x17f9   :  { %4430 = vmatmul.mubr.msk.f32.vlgmr.msra.gmra.mrb[36].mxu0 %vm298_vm6, %v2681_v26  ;;  %4444 = vmatprep.subr.mxu1 %v4698_v11 }
0x17fa   :  { %4439 = vmatpush3.bf16.msra.mxu0 %v2886_v27  ;;  %4440 = vmatprep.mubr.msk.bf16.mxu0 %vm4699_vm5, %v4698_v11 }
0x17fb   :  { %4449 = vmatprep.subr.mxu0 %v4698_v11 }
0x17fd   :  { %4441 = vmatmul.mubr.msk.bf16.vlgmr.msra.gmra.mrb[40].mxu0 %vm298_vm6, %v2503_v43 }
0x17fe   :  { %4451 = vmatprep.mubr.msk.f32.mxu0 %vm4699_vm5, %v4698_v11 }
0x1803   :  { %4450 = vmatpush3.xpose.msk.msra.mxu0 %vm298_vm6, %v3010_v28 }
0x1804   :  { %4459 = vmatprep.subr.mxu0 %v4698_v11 }
0x1806   :  { %4452 = vmatmul.mubr.msk.f32.vlgmr.msra.gmra.mrb[38].mxu0 %vm298_vm6, %v3008_v30 }
0x1807   :  { %4461 = vmatprep.mubr.msk.f32.mxu0 %vm4699_vm5, %v4698_v11 }
0x18ca   :  { %v2754_v31 = vpop.f32.mrb[42].mxu1 }
0x18cb   :  { %v4426_v32 = vpop.f32.mrb[43].mxu1 }
0x18cc   :  { %v2830_v33 = vpop.f32.mrb[36].mxu0 }
0x18cd   :  { %v2834_v34 = vpack.c.bf16 %v2830_v33, %v2754_v31  ;;  %v4431_v35 = vpop.f32.mrb[37].mxu0 }
0x18cf   :  { %4435 = vmatmul.mubr.msk.bf16.vlgmr.msra.gmra.mrb[44].mxu1 %vm298_vm6, %v2834_v34 }
0x18d0   :  { %4445 = vmatpush3.xpose.msk.msra.mxu1 %vm298_vm6, %v2932_v36  ;;  %v2922_v12 = vpop.f32.mrb[40].mxu0  ;;  %4446 = vmatprep.mubr.msk.f32.mxu1 %vm4699_vm5, %v4698_v11 }
0x18d1   :  { %v4442_v63 = vpop.f32.mrb[41].mxu0  ;;  %4454 = vmatprep.subr.mxu1 %v4698_v11 }
0x18d2   :  { %v2925_v37 = vpop.f32.mrb[42].mxu0  ;;  %v4045_v63 = vld [vmem:[%s5438_s7 + $0x18] sm:$0xf] }
0x18d3   :  { %v4443_v38 = vpop.f32.mrb[43].mxu0 }
0x18d7   :  { %4447 = vmatmul.mubr.msk.f32.vlgmr.msra.gmra.mrb[48].mxu1 %vm298_vm6, %v2930_v39 }
0x18d8   :  { %4456 = vmatprep.mubr.msk.f32.mxu1 %vm4699_vm5, %v4698_v11 }
0x18d9   :  { %v3081_v40 = vpop.f32.mrb[38].mxu0 }
0x18da   :  { %v3082_v2 = vadd.f32 %v3081_v40, %v4911_v29  ;;  %v4453_v41 = vpop.f32.mrb[39].mxu0 }
0x18dc   :  { %v3088_v3 = vsel %vm298_vm6, %v3082_v2, -inf }
0x18dd   :  { %3089 = vmax.xlane.f32.xlu1 %v3088_v3 }
0x18ee   :  { %3311 = vrot.lane.b32.xlu1 %v5167_v0, %s4707_s3 }
0x18f2   :  { %3309 = vrot.lane.b32.xlu1 %v5167_v0, %s4708_s15 }
0x18f6   :  { %3387 = vrot.lane.b32.xlu1 %v5169_v5, %s4708_s15 }
0x196a   :  { %v3090_v43 = vpop.xlane.xlu1 %3089 }
0x196b   :  { %v3092_v44 = vsub.f32 %v3082_v2, %v3090_v43 }
0x196d   :  { %v3095_v45 = vmul.f32 1.442695, %v3092_v44 }
0x196e   :  { %v3312_v14 = vpop.permute.xlu1 %3311 }
0x196f   :  { %4641 = vpow2.f32 %v3095_v45 }
0x1972   :  { %v3310_v18 = vpop.permute.xlu1 %3309 }
0x1976   :  { %v3388_v19 = vpop.permute.xlu1 %3387 }
0x1979   :  { %v4642_v47 = vpop.eup %4641 }
0x197a   :  { %v3100_v48 = vsel %vm298_vm6, %v4642_v47, 0.0 }
0x197b   :  { %3101 = vadd.xlane.f32.xlu0 %v3100_v48 }
0x1991   :  { %3183 = vrot.lane.b32.xlu0 %v5169_v5, %s4709_s16 }
0x1995   :  { %3389 = vrot.lane.b32.xlu0 %v5169_v5, %s4707_s3 }
0x19a2   :  { %v2875_v49 = vpop.f32.mrb[44].mxu1 }
0x19a3   :  { %v5288_v50 = vadd.f32 %v2922_v12, %v2875_v49  ;;  %v4436_v51 = vpop.f32.mrb[45].mxu1 }
0x19a4   :  { %v2878_v58 = vpop.f32.mrb[46].mxu1 }
0x19a5   :  { %v5290_v59 = vadd.f32 %v2925_v37, %v2878_v58  ;;  %v4437_v61 = vpop.f32.mrb[47].mxu1 }
0x19aa   :  { %v3003_v20 = vpop.f32.mrb[48].mxu1 }
0x19ab   :  { %v4448_v4 = vpop.f32.mrb[49].mxu1  ;;  %v3004_v6 = vadd.f32 %v3003_v20, %v4907_v24 }
0x19ad   :  { %v3085_v8 = vsel %vm298_vm6, %v3004_v6, -inf }
0x19b4   :  { %3086 = vmax.xlane.f32.xlu0 %v3085_v8  ;;  %v4046_v8 = vld [vmem:[%s5438_s7 + $0x1c] sm:$0xf] }
0x19ca   :  { %3107 = vrot.lane.b32.xlu0 %v5167_v0, %s4709_s16 }
0x19ce   :  { %3487 = vrot.lane.b32.xlu0 %v5167_v0, %s4710_s17 }
0x1a08   :  { %v3102_v9 = vpop.xlane.xlu0 %3101 }
0x1a09   :  { %4643 = vrcp.f32 %v3102_v9  ;;  %v3644_v9 = vsel %vm79_vm0, %v4046_v8, 0  ;;  %v4571_v8 = vld [vmem:[%s5442_s11 + $0x30] sm:$0xff]  }
0x1a0c   :  { %v3184_v10 = vpop.permute.xlu0 %3183 }
0x1a0d   :  { %4460 = vmatpush3.msra.mxu0 %v3184_v10 }
0x1a0e   :  { %4470 = vmatprep.subr.mxu0 %v4698_v11 }
0x1a10   :  { %v3390_v0 = vpop.permute.xlu0 %3389 }
0x1a13   :  { %v4644_v15 = vpop.eup %4643 }
0x1a14   :  { %v3106_v16 = vmul.f32 %v4644_v15, %v4642_v47 }
0x1a16   :  { %4462 = vmatmul.mubr.msk.f32.vlgmr.msra.gmra.mrb[44].mxu0 %vm298_vm6, %v3106_v16 }
0x1a17   :  { %4471 = vmatpush3.xpose.msk.msra.mxu0 %vm298_vm6, %v3312_v14  ;;  %4472 = vmatprep.mubr.msk.f32.mxu0 %vm4699_vm5, %v4698_v11 }
0x1a18   :  { %4475 = vmatprep.subr.mxu0 %v4698_v11 }
0x1a1a   :  { %4473 = vmatmul.mubr.msk.f32.vlgmr.msra.gmra.mrb[46].mxu0 %vm298_vm6, %v3310_v18 }
0x1a1b   :  { %4476 = vmatpush3.xpose.msk.msra.mxu0 %vm298_vm6, %v3390_v0  ;;  %4477 = vmatprep.mubr.msk.f32.mxu0 %vm4699_vm5, %v4698_v11 }
0x1a1c   :  { %4485 = vmatprep.subr.mxu0 %v4698_v11 }
0x1a1e   :  { %4478 = vmatmul.mubr.msk.f32.vlgmr.msra.gmra.mrb[48].mxu0 %vm298_vm6, %v3388_v19 }
0x1a1f   :  { %4487 = vmatprep.mubr.msk.f32.mxu0 %vm4699_vm5, %v4698_v11 }
0x1a41   :  { %v3087_v62 = vpop.xlane.xlu0 %3086 }
0x1a42   :  { %v3091_v13 = vsub.f32 %v3004_v6, %v3087_v62 }
0x1a44   :  { %v3093_v17 = vmul.f32 1.442695, %v3091_v13 }
0x1a45   :  { %v3108_v21 = vpop.permute.xlu0 %3107 }
0x1a46   :  { %4645 = vpow2.f32 %v3093_v17  ;;  %4455 = vmatpush3.msra.mxu1 %v3108_v21 }
0x1a47   :  { %4464 = vmatprep.subr.bf16.mxu1 %v4698_v11 }
0x1a49   :  { %v3488_v49 = vpop.permute.xlu0 %3487 }
0x1a50   :  { %v4646_v22 = vpop.eup %4645 }
0x1a51   :  { %v3097_v1 = vsel %vm298_vm6, %v4646_v22, 0.0 }
0x1a52   :  { %3098 = vadd.xlane.f32.xlu1 %v3097_v1 }
0x1adf   :  { %v3099_v23 = vpop.xlane.xlu1 %3098 }
0x1ae0   :  { %4647 = vrcp.f32 %v3099_v23 }
0x1ae9   :  { %v3255_v25 = vpop.f32.mrb[44].mxu0 }
0x1aea   :  { %v4648_v26 = vpop.eup %4647  ;;  %v4463_v27 = vpop.f32.mrb[45].mxu0 }
0x1aeb   :  { %v3105_v28 = vmul.f32 %v4648_v26, %v4646_v22  ;;  %v5354_v22 = vld [vmem:[%s5439_s8 + $0x8] sm:$0x3f] }
0x1aed   :  { %4457 = vmatmul.mubr.msk.f32.vlgmr.msra.gmra.mrb[50].mxu1 %vm298_vm6, %v3105_v28  ;;  %v3383_v30 = vpop.f32.mrb[46].mxu0 }
0x1aee   :  { %v3384_v31 = vadd.f32 %v3383_v30, %v4907_v24  ;;  %v4474_v32 = vpop.f32.mrb[47].mxu0  ;;  %4466 = vmatprep.mubr.msk.bf16.mxu1 %vm4699_vm5, %v4698_v11  ;;  %v3264_v24 = vsel %vm79_vm0, %v4045_v63, 0 }
0x1aef   :  { %4465 = vmatpush3.bf16.msra.mxu1 %v3264_v24 }
0x1af0   :  { %v3465_v33 = vsel %vm298_vm6, %v3384_v31, -inf  ;;  %4480 = vmatprep.subr.mxu1 %v4698_v11 }
0x1af1   :  { %v3461_v34 = vpop.f32.mrb[48].mxu0  ;;  %3466 = vmax.xlane.f32.xlu1 %v3465_v33 }
0x1af2   :  { %v3462_v35 = vadd.f32 %v3461_v34, %v4911_v29  ;;  %v4479_v36 = vpop.f32.mrb[49].mxu0 }
0x1af4   :  { %v3468_v12 = vsel %vm298_vm6, %v3462_v35, -inf }
0x1af5   :  { %3469 = vmax.xlane.f32.xlu1 %v3468_v12 }
0x1b7e   :  { %v3467_v37 = vpop.xlane.xlu1 %3466 }
0x1b7f   :  { %v3471_v38 = vsub.f32 %v3384_v31, %v3467_v37 }
0x1b81   :  { %v3473_v39 = vmul.f32 1.442695, %v3471_v38 }
0x1b82   :  { %v3470_v40 = vpop.xlane.xlu1 %3469 }
0x1b83   :  { %4649 = vpow2.f32 %v3473_v39  ;;  %v3472_v2 = vsub.f32 %v3462_v35, %v3470_v40  ;;  %v4567_v39 = vld [vmem:[%s5440_s9 + $0x10] sm:$0xff]   ;;  %v4568_v40 = vld [vmem:[%s5440_s9 + $0x18] sm:$0xff]  }
0x1b85   :  { %v3475_v29 = vmul.f32 1.442695, %v3472_v2 }
0x1b87   :  { %4651 = vpow2.f32 %v3475_v29 }
0x1b8d   :  { %v4650_v41 = vpop.eup %4649 }
0x1b8e   :  { %v3477_v3 = vsel %vm298_vm6, %v4650_v41, 0.0 }
0x1b8f   :  { %3478 = vadd.xlane.f32.xlu1 %v3477_v3 }
0x1b91   :  { %v4652_v43 = vpop.eup %4651 }
0x1b92   :  { %v3480_v44 = vsel %vm298_vm6, %v4652_v43, 0.0 }
0x1b93   :  { %3481 = vadd.xlane.f32.xlu1 %v3480_v44 }
0x1ba4   :  { %3563 = vrot.lane.b32.xlu1 %v5169_v5, %s4710_s17 }
0x1bc0   :  { %v3179_v45 = vpop.f32.mrb[50].mxu1 }
0x1bc1   :  { %v3259_v47 = vpack.c.bf16 %v3255_v25, %v3179_v45  ;;  %v4458_v48 = vpop.f32.mrb[51].mxu1 }
0x1bc3   :  { %4467 = vmatmul.mubr.msk.bf16.vlgmr.msra.gmra.mrb[52].mxu1 %vm298_vm6, %v3259_v47  ;;  %v3726_v47 = vrot.slane %v5354_v22, %v4858_v60  ;;  %v4569_v60 = vld [vmem:[%s5442_s11 + $0x20] sm:$0xff]  }
0x1bc4   :  { %4481 = vmatpush3.msra.mxu1 %v3488_v49  ;;  %4482 = vmatprep.mubr.msk.f32.mxu1 %vm4699_vm5, %v4698_v11 }
0x1bc5   :  { %4490 = vmatprep.subr.bf16.mxu1 %v4698_v11 }
0x1c1c   :  { %v3479_v51 = vpop.xlane.xlu1 %3478 }
0x1c1d   :  { %4653 = vrcp.f32 %v3479_v51 }
0x1c20   :  { %v3482_v58 = vpop.xlane.xlu1 %3481 }
0x1c21   :  { %4655 = vrcp.f32 %v3482_v58 }
0x1c24   :  { %v3564_v61 = vpop.permute.xlu1 %3563 }
0x1c25   :  { %4486 = vmatpush3.msra.mxu0 %v3564_v61  ;;  %v3732_v61 = vrot.slane %v5354_v22, %v1852_v53  ;;  %v4570_v53 = vld [vmem:[%s5442_s11 + $0x28] sm:$0xff]  }
0x1c26   :  { %4496 = vmatprep.subr.bf16.mxu0 %v4698_v11 }
0x1c27   :  { %v4654_v5 = vpop.eup %4653 }
0x1c28   :  { %v3485_v20 = vmul.f32 %v4654_v5, %v4650_v41 }
0x1c2a   :  { %4483 = vmatmul.mubr.msk.f32.vlgmr.msra.gmra.mrb[56].mxu1 %vm298_vm6, %v3485_v20 }
0x1c2b   :  { %v4656_v4 = vpop.eup %4655  ;;  %4492 = vmatprep.mubr.msk.bf16.mxu1 %vm4699_vm5, %v4698_v11  ;;  %4491 = vmatpush3.bf16.msra.mxu1 %v3644_v9  ;;  %v4572_v9 = vld [vmem:[%s5442_s11 + $0x38] sm:$0xff]  }
0x1c2c   :  { %v3486_v6 = vmul.f32 %v4656_v4, %v4652_v43  ;;  %4504 = vmatprep.subr.bf16.mxu1 %v4698_v11 }
0x1c2e   :  { %4488 = vmatmul.mubr.msk.f32.vlgmr.msra.gmra.mrb[50].mxu0 %vm298_vm6, %v3486_v6 }
0x1c2f   :  { %4500 = vmatprep.mubr.msk.bf16.mxu0 %vm4699_vm5, %v4698_v11  ;;  %4497 = vmatpush3.bf16.msra.mxu0 %v4567_v39 }
0x1c30   :  { %4498 = vmatprep.subr.bf16.mxu0 %v4698_v11 }
0x1c33   :  { %4499 = vmatpush3.bf16.msra.mxu0 %v4568_v40 }
0x1c96   :  { %v3300_v10 = vpop.f32.mrb[52].mxu1 }
0x1c97   :  { %v3307_v14 = vadd.f32 %v3300_v10, %v5288_v50  ;;  %v4468_v15 = vpop.f32.mrb[53].mxu1  ;;  %v4089_v10 = vld [vmem:[%s5441_s10 + $0x1] ss:$0 sm:$0xff]  ;;  %s4712_s10 = smov [#allocation2]  }
0x1c98   :  { %v3303_v16 = vpop.f32.mrb[54].mxu1  ;;  %s3988_s11 = sshll.u32 %s4712_s10, 4  ;;  %s3989_s11 = int_to_ptr.vmem [resolvable:$true] %s3988_s11 }
0x1c99   :  { %v3308_v18 = vadd.f32 %v3303_v16, %v5290_v59  ;;  %v4469_v0 = vpop.f32.mrb[55].mxu1  ;;  %v3694_v59 = vrot.slane %v5354_v22, %v4851_v55  ;;  %s4673_s2 = scalar_lea.vmem %s3989_s11, 32  ;;  %p4678_p1 = scmp.lt.s32.totalorder %s3989_s11, %s3989_s11 }
0x1c9a   :  { %p4674_p0 = scmp.ne.s32.totalorder %s3989_s11, %s4673_s2  ;;  %p4679_p2 = scmp.lt.s32.totalorder %s4673_s2, %s4673_s2 }
0x1c9c   :  { %p4680_p3 = por %p4679_p2, %p4678_p1 }
0x1c9e   :  { %p4681_p4 = pnand %p4680_p3, %p4674_p0 }
0x1cfd   :  { %v3559_v19 = vpop.f32.mrb[56].mxu1 }
0x1cfe   :  { %v4484_v62 = vpop.f32.mrb[57].mxu1 }
0x1d01   :  { %v3635_v13 = vpop.f32.mrb[50].mxu0 }
0x1d02   :  { %v3639_v17 = vpack.c.bf16 %v3635_v13, %v3559_v19  ;;  %v4489_v21 = vpop.f32.mrb[51].mxu0 }
0x1d04   :  { %4493 = vmatmul.mubr.msk.bf16.vlgmr.msra.gmra.mrb[60].mxu1 %vm298_vm6, %v3639_v17 }
0x1d05   :  { %4512 = vmatprep.mubr.msk.bf16.mxu1 %vm4699_vm5, %v4698_v11  ;;  %4505 = vmatpush3.bf16.msra.mxu1 %v4569_v60 }
0x1d06   :  { %4506 = vmatprep.subr.bf16.mxu1 %v4698_v11 }
0x1d09   :  { %4507 = vmatpush3.bf16.msra.mxu1 %v4570_v53 }
0x1d0a   :  { %4508 = vmatprep.subr.bf16.mxu1 %v4698_v11 }
0x1d0d   :  { %4509 = vmatpush3.bf16.msra.mxu1 %v4571_v8 }
0x1d0e   :  { %4510 = vmatprep.subr.bf16.mxu1 %v4698_v11 }
0x1d11   :  { %4511 = vmatpush3.bf16.msra.mxu1 %v4572_v9 }
0x1dd7   :  { %v3680_v50 = vpop.f32.mrb[60].mxu1 }
0x1dd8   :  { %v3687_v1 = vadd.f32 %v3680_v50, %v3307_v14  ;;  %v4494_v23 = vpop.f32.mrb[61].mxu1 }
0x1dd9   :  { %v3683_v25 = vpop.f32.mrb[62].mxu1 }
0x1dda   :  { %v3689_v26 = vadd.f32 %v3687_v1, %v5155_v52  ;;  %v3688_v27 = vadd.f32 %v3683_v25, %v3308_v18  ;;  %v4495_v28 = vpop.f32.mrb[63].mxu1 }
0x1ddc   :  { %v3690_v30 = vadd.f32 %v3688_v27, %v5157_v56  ;;  %v3695_v31 = vadd.f32 %v3694_v59, %v3689_v26 }
0x1dde   :  { %v3697_v32 = vsel %vm162_vm4, %v3695_v31, 0.0  ;;  %v3696_v33 = vadd.f32 %v3694_v59, %v3690_v30 }
0x1ddf   :  { %3698 = vadd.xlane.f32.xlu0 %v3697_v32 }
0x1de0   :  { %v3700_v34 = vsel %vm162_vm4, %v3696_v33, 0.0 }
0x1de1   :  { %3701 = vadd.xlane.f32.xlu1 %v3700_v34 }
0x1e6c   :  { %v3699_v35 = vpop.xlane.xlu0 %3698 }
0x1e6d   :  { %v3703_v36 = vmul.f32 0.03125, %v3699_v35 }
0x1e6e   :  { %v3702_v12 = vpop.xlane.xlu1 %3701 }
0x1e6f   :  { %v3705_v63 = vsub.f32 %v3695_v31, %v3703_v36  ;;  %v3704_v55 = vmul.f32 0.03125, %v3702_v12 }
0x1e71   :  { %v3706_v24 = vsub.f32 %v3696_v33, %v3704_v55  ;;  %v3707_v37 = vmul.f32 %v3705_v63, %v3705_v63 }
0x1e73   :  { %v3709_v52 = vsel %vm162_vm4, %v3707_v37, 0.0  ;;  %v3708_v38 = vmul.f32 %v3706_v24, %v3706_v24 }
0x1e74   :  { %3710 = vadd.xlane.f32.xlu0 %v3709_v52 }
0x1e75   :  { %v3712_v56 = vsel %vm162_vm4, %v3708_v38, 0.0 }
0x1e78   :  { %3713 = vadd.xlane.f32.xlu0 %v3712_v56 }
0x1f01   :  { %v3711_v2 = vpop.xlane.xlu0 %3710 }
0x1f02   :  { %v3715_v29 = vmul.f32 0.03125, %v3711_v2 }
0x1f04   :  { %v3717_v41 = vadd.f32 1e-12, %v3715_v29 }
0x1f05   :  { %v3714_v3 = vpop.xlane.xlu0 %3713 }
0x1f06   :  { %4657 = vrsqrt.f32 %v3717_v41  ;;  %v3716_v43 = vmul.f32 0.03125, %v3714_v3 }
0x1f08   :  { %v3718_v44 = vadd.f32 1e-12, %v3716_v43 }
0x1f0a   :  { %4659 = vrsqrt.f32 %v3718_v44 }
0x1f10   :  { %v4658_v45 = vpop.eup %4657 }
0x1f11   :  { %v3721_v48 = vmul.f32 %v4658_v45, %v3705_v63 }
0x1f13   :  { %v3727_v51 = vmul.f32 %v3726_v47, %v3721_v48 }
0x1f14   :  { %v4660_v49 = vpop.eup %4659 }
0x1f15   :  { %v3722_v58 = vmul.f32 %v4660_v49, %v3706_v24  ;;  %v5376_v20 = vadd.f32 %v3732_v61, %v3727_v51 }
0x1f17   :  { %v3728_v5 = vmul.f32 %v3726_v47, %v3722_v58 }
0x1f19   :  { %v5378_v4 = vadd.f32 %v3732_v61, %v3728_v5 }
0x1f1b   :  { %v3735_v6 = vpack.c.bf16 %v5378_v4, %v5376_v20 }
0x1f1d   :  { %4501 = vmatmul.mubr.msk.bf16.vlgmr.msra.gmra.mrb[52].mxu0 %vm162_vm4, %v3735_v6 }
0x1ff0   :  { %v3798_v14 = vpop.f32.mrb[52].mxu0 }
0x1ff1   :  { %v3799_v15 = vadd.f32 %v4089_v10, %v3798_v14  ;;  %v4502_v16 = vpop.f32.mrb[53].mxu0 }
0x1ff2   :  { %v3801_v18 = vpop.f32.mrb[54].mxu0  ;;  %v3870_v16 = vrot.slane %v5354_v22, %v1987_v7 }
0x1ff3   :  { %v3807_v0 = vmul.f32 0.70710677, %v3799_v15  ;;  %v3802_v19 = vadd.f32 %v4089_v10, %v3801_v18  ;;  %v4503_v62 = vpop.f32.mrb[55].mxu0  ;;  %v3805_v60 = vmul.f32 0.5, %v3799_v15 }
0x1ff5   :  { %v3813_v13 = vand.u32 2147483647, %v3807_v0  ;;  %v3808_v17 = vmul.f32 0.70710677, %v3802_v19  ;;  %vm3809_vm10 = vcmp.ge.f32.partialorder %v3807_v0, 0.0  ;;  %v3806_v53 = vmul.f32 0.5, %v3802_v19 }
0x1ff6   :  { %v3811_v48 = vsel %vm3809_vm10, 1.0, %v4711_v57 }
0x1ff7   :  { %v3815_v21 = vmul.f32 0.3275911, %v3813_v13  ;;  %v3814_v11 = vand.u32 2147483647, %v3808_v17  ;;  %v3839_v59 = vsub.f32 0.0, %v3813_v13  ;;  %vm3810_vm11 = vcmp.ge.f32.partialorder %v3808_v17, 0.0 }
0x1ff8   :  { %v3812_v61 = vsel %vm3810_vm11, 1.0, %v4711_v57 }
0x1ff9   :  { %v3817_v50 = vadd.f32 1.0, %v3815_v21  ;;  %v3816_v1 = vmul.f32 0.3275911, %v3814_v11  ;;  %v3840_v25 = vsub.f32 0.0, %v3814_v11  ;;  %v3841_v27 = vmul.f32 %v3839_v59, %v3813_v13 }
0x1ffb   :  { %4661 = vrcp.f32 %v3817_v50  ;;  %v3818_v23 = vadd.f32 1.0, %v3816_v1  ;;  %v3842_v32 = vmul.f32 %v3840_v25, %v3814_v11  ;;  %v3843_v33 = vmul.f32 1.442695, %v3841_v27 }
0x1ffd   :  { %4663 = vrcp.f32 %v3818_v23  ;;  %v3845_v63 = vmul.f32 1.442695, %v3842_v32 }
0x1ffe   :  { %4665 = vpow2.f32 %v3843_v33 }
0x1fff   :  { %4667 = vpow2.f32 %v3845_v63  ;;  %v3976_v63 = vrot.slane %v5354_v22, %v2094_v46 }
0x2005   :  { %v4662_v26 = vpop.eup %4661 }
0x2006   :  { %v3821_v28 = vmul.f32 1.0614054, %v4662_v26 }
0x2007   :  { %v4664_v30 = vpop.eup %4663 }
0x2008   :  { %v3823_v31 = vadd.f32 -1.4531521, %v3821_v28  ;;  %v3822_v34 = vmul.f32 1.0614054, %v4664_v30  ;;  %v4666_v41 = vpop.eup %4665 }
0x2009   :  { %v4668_v45 = vpop.eup %4667 }
0x200a   :  { %v3825_v35 = vmul.f32 %v4662_v26, %v3823_v31  ;;  %v3824_v36 = vadd.f32 -1.4531521, %v3822_v34 }
0x200c   :  { %v3827_v12 = vadd.f32 1.4214138, %v3825_v35  ;;  %v3826_v55 = vmul.f32 %v4664_v30, %v3824_v36  ;;  %v3970_v35 = vrot.slane %v5354_v22, %v2088_v42 }
0x200e   :  { %v3829_v24 = vmul.f32 %v4662_v26, %v3827_v12  ;;  %v3828_v37 = vadd.f32 1.4214138, %v3826_v55 }
0x2010   :  { %v3831_v52 = vadd.f32 -0.28449672, %v3829_v24  ;;  %v3830_v38 = vmul.f32 %v4664_v30, %v3828_v37 }
0x2012   :  { %v3833_v56 = vmul.f32 %v4662_v26, %v3831_v52  ;;  %v3832_v39 = vadd.f32 -0.28449672, %v3830_v38 }
0x2014   :  { %v3835_v40 = vadd.f32 0.2548296, %v3833_v56  ;;  %v3834_v2 = vmul.f32 %v4664_v30, %v3832_v39 }
0x2016   :  { %v3837_v29 = vmul.f32 %v4662_v26, %v3835_v40  ;;  %v3836_v3 = vadd.f32 0.2548296, %v3834_v2 }
0x2018   :  { %v3847_v43 = vmul.f32 %v4666_v41, %v3837_v29  ;;  %v3838_v44 = vmul.f32 %v4664_v30, %v3836_v3 }
0x201a   :  { %v3849_v47 = vsub.f32 1.0, %v3847_v43  ;;  %v3848_v49 = vmul.f32 %v4668_v45, %v3838_v44 }
0x201c   :  { %v3851_v51 = vmul.f32 %v3849_v47, %v3811_v48  ;;  %v3850_v58 = vsub.f32 1.0, %v3848_v49 }
0x201e   :  { %v3853_v5 = vadd.f32 1.0, %v3851_v51  ;;  %v3852_v6 = vmul.f32 %v3850_v58, %v3812_v61 }
0x2020   :  { %v3854_v8 = vadd.f32 1.0, %v3852_v6  ;;  %v3855_v9 = vmul.f32 %v3853_v5, %v3805_v60 }
0x2022   :  { %v3856_v10 = vmul.f32 %v3854_v8, %v3806_v53 }
0x2024   :  { %v3857_v14 = vpack.c.bf16 %v3856_v10, %v3855_v9 }
0x2026   :  { %4513 = vmatmul.mubr.msk.bf16.vlgmr.msra.gmra.mrb[64].mxu1 %vm2013_vm9, %v3857_v14 }
0x20f9   :  { %v3932_v18 = vpop.f32.mrb[64].mxu1 }
0x20fa   :  { %v3933_v0 = vadd.f32 %v3932_v18, %v3870_v16  ;;  %v4514_v62 = vpop.f32.mrb[65].mxu1 }
0x20fb   :  { %v3935_v13 = vpop.f32.mrb[66].mxu1 }
0x20fc   :  { %v3936_v17 = vadd.f32 %v3935_v13, %v3870_v16  ;;  %v4515_v57 = vpop.f32.mrb[67].mxu1  ;;  %v3939_v21 = vadd.f32 %v3933_v0, %v5376_v20 }
0x20fe   :  { %v3940_v15 = vadd.f32 %v3936_v17, %v5378_v4  ;;  %v3941_v19 = vsel %vm162_vm4, %v3939_v21, 0.0 }
0x20ff   :  { %3942 = vadd.xlane.f32.xlu0 %v3941_v19 }
0x2100   :  { %v3944_v11 = vsel %vm162_vm4, %v3940_v15, 0.0 }
0x2103   :  { %3945 = vadd.xlane.f32.xlu0 %v3944_v11 }
0x218c   :  { %v3943_v50 = vpop.xlane.xlu0 %3942 }
0x218d   :  { %v3947_v1 = vmul.f32 0.03125, %v3943_v50 }
0x218f   :  { %v3949_v23 = vsub.f32 %v3939_v21, %v3947_v1 }
0x2190   :  { %v3946_v7 = vpop.xlane.xlu0 %3945 }
0x2191   :  { %v3948_v59 = vmul.f32 0.03125, %v3946_v7  ;;  %v3951_v25 = vmul.f32 %v3949_v23, %v3949_v23 }
0x2193   :  { %v3950_v26 = vsub.f32 %v3940_v15, %v3948_v59  ;;  %v3953_v27 = vsel %vm162_vm4, %v3951_v25, 0.0 }
0x2194   :  { %3954 = vadd.xlane.f32.xlu0 %v3953_v27 }
0x2195   :  { %v3952_v28 = vmul.f32 %v3950_v26, %v3950_v26 }
0x2197   :  { %v3956_v20 = vsel %vm162_vm4, %v3952_v28, 0.0 }
0x2198   :  { %3957 = vadd.xlane.f32.xlu1 %v3956_v20 }
0x2221   :  { %v3955_v4 = vpop.xlane.xlu0 %3954 }
0x2222   :  { %v3959_v30 = vmul.f32 0.03125, %v3955_v4 }
0x2224   :  { %v3961_v31 = vadd.f32 1e-12, %v3959_v30 }
0x2225   :  { %v3958_v32 = vpop.xlane.xlu1 %3957 }
0x2226   :  { %4669 = vrsqrt.f32 %v3961_v31  ;;  %v3960_v33 = vmul.f32 0.03125, %v3958_v32 }
0x2228   :  { %v3962_v34 = vadd.f32 1e-12, %v3960_v33 }
0x222a   :  { %4671 = vrsqrt.f32 %v3962_v34 }
0x2230   :  { %v4670_v36 = vpop.eup %4669 }
0x2231   :  { %v3965_v12 = vmul.f32 %v4670_v36, %v3949_v23 }
0x2233   :  { %v3971_v55 = vmul.f32 %v3970_v35, %v3965_v12 }
0x2234   :  { %v4672_v24 = vpop.eup %4671 }
0x2235   :  { %v3966_v37 = vmul.f32 %v4672_v24, %v3950_v26  ;;  %v3977_v52 = vadd.f32 %v3976_v63, %v3971_v55 }
0x2237   :  { %v3972_v38 = vmul.f32 %v3970_v35, %v3966_v37  ;;  %3980 = vst.msk [vmem:[#allocation2] sm:$0x1] %vm3979_vm12, %v3977_v52 }
0x2239   :  { %v3978_v56 = vadd.f32 %v3976_v63, %v3972_v38 }
0x223b   :  { %3981 = vst.msk [vmem:[#allocation2 + $0x1] sm:$0x1] %vm3979_vm12, %v3978_v56 }
0x223c   :  { %4684 = shalt.err (!%p4681_p4)
}
0x223d   :  { %s4685_s18 = scalar_lea.hbm %s5443_s12, 32 }
0x223e   :  { %p4686_p5 = scmp.ne.s32.totalorder %s5443_s12, %s4685_s18  ;;  %p4689_p6 = scmp.lt.u32.totalorder %s4685_s18, %s5443_s12 }
0x2240   :  { %p4691_p7 = pnand %p4689_p6, %p4686_p5 }
0x2242   :  { %4694 = shalt.err (!%p4691_p7)
}
0x2243   :  { %3991 = dma.vmem_to_hbm [thread:$0]  %s3989_s11, 32, %s5443_s12, [#allocation3]  }
0x2244   :  { %4695 = dma.done.wait [#allocation3], 32  }
0x2245   :  { %4696 = vsyncadd [#allocation3], 4294967264 }
0x2246   :  { %3995 = vsyncpa [#allocation3], 1 }

</bundles_post_ra>
